<compile_context>
chip_gen: v5e
topology: v5e:2x2
jax: 0.10.0
libtpu: 0.0.40
codegen_flags: <defaults>
</compile_context>

<pallas_src>
import functools

import jax
import jax.numpy as jnp
from jax.experimental import pallas as pl
from jax.experimental.pallas import tpu as pltpu

_EPS = 1e-5
_LANE = 128


def _round_up(x, m):
    return (x + m - 1) // m * m


def _vmem_limit_bytes():
    # Generation-appropriate VMEM request (v7x has only 64 MiB per TensorCore).
    try:
        cap = int(pltpu.get_tpu_info().vmem_capacity_bytes)
    except Exception:
        cap = 64 * 1024 * 1024
    return max(min((cap * 3) // 4, 96 * 1024 * 1024), 32 * 1024 * 1024)


_VMEM_LIMIT = _vmem_limit_bytes()


def _compiler_params():
    return pltpu.CompilerParams(
        dimension_semantics=("parallel",),   # output-channel tiles are independent
        vmem_limit_bytes=_VMEM_LIMIT,
    )


# ---------------------------------------------------------------------------
# Shared in-kernel epilogues
# ---------------------------------------------------------------------------

def _bn(acc, g, b, eps):
    mean = jnp.mean(acc, axis=0, keepdims=True)
    dev = acc - mean
    var = jnp.mean(dev * dev, axis=0, keepdims=True)
    return dev * jax.lax.rsqrt(var + eps) * g + b


def _bn_masked(acc, msk, g, b, inv_count, eps):
    mean = jnp.sum(acc * msk, axis=0, keepdims=True) * inv_count
    dev = (acc - mean) * msk
    var = jnp.sum(dev * dev, axis=0, keepdims=True) * inv_count
    return (acc - mean) * jax.lax.rsqrt(var + eps) * g + b


# ---------------------------------------------------------------------------
# Pallas kernels
# ---------------------------------------------------------------------------

def _conv1x1_bn_kernel(x_ref, w_ref, g_ref, b_ref, o_ref, *, relu, eps):
    """x:(M,K) bf16, w:(K,Ct) bf16. MXU matmul + batch-stat BN (+ReLU)."""
    acc = jnp.dot(x_ref[...], w_ref[...], preferred_element_type=jnp.float32)
    y = _bn(acc, g_ref[...], b_ref[...], eps)
    if relu:
        y = jnp.maximum(y, 0.0)
    o_ref[...] = y.astype(o_ref.dtype)


def _conv1x1_bn_add_relu_kernel(x_ref, w_ref, g_ref, b_ref, id_ref, o_ref, *, eps):
    """conv3 + BN fused with residual add (identity passthrough) + ReLU."""
    acc = jnp.dot(x_ref[...], w_ref[...], preferred_element_type=jnp.float32)
    y = _bn(acc, g_ref[...], b_ref[...], eps)
    o_ref[...] = jnp.maximum(y + id_ref[...], 0.0).astype(o_ref.dtype)


def _conv1x1_bn_ds_add_relu_kernel(x_ref, w_ref, g_ref, b_ref,
                                   xd_ref, wd_ref, gd_ref, bd_ref, o_ref, *, eps):
    """conv3+BN and downsample-conv+BN both computed here, then add + ReLU."""
    def branch(xr, wr, gr, br):
        acc = jnp.dot(xr[...], wr[...], preferred_element_type=jnp.float32)
        return _bn(acc, gr[...], br[...], eps)

    y = branch(x_ref, w_ref, g_ref, b_ref) + branch(xd_ref, wd_ref, gd_ref, bd_ref)
    o_ref[...] = jnp.maximum(y, 0.0).astype(o_ref.dtype)


def _conv3x3_bn_relu_kernel(z_ref, w_ref, g_ref, b_ref, m_ref, o_ref, *,
                            pitch, inv_count, eps):
    """3x3 stride-1 conv as 9 shifted matmuls over one flattened padded buffer.

    z:(Zr,C) bf16 flattened padded activation; w:(9,C,Ct) bf16; m:(T,1) f32
    validity mask (1 at real output positions).  BN statistics are masked so
    only those positions contribute; invalid rows hold garbage that the
    wrapper discards.
    """
    t_rows = o_ref.shape[0]
    acc = None
    for i in range(3):
        for j in range(3):
            part = jnp.dot(z_ref[pl.ds(i * pitch + j, t_rows), :],
                           w_ref[i * 3 + j],
                           preferred_element_type=jnp.float32)
            acc = part if acc is None else acc + part
    y = _bn_masked(acc, m_ref[...], g_ref[...], b_ref[...], inv_count, eps)
    o_ref[...] = jnp.maximum(y, 0.0).astype(o_ref.dtype)


def _conv3x3_bn_relu_strided_kernel(z0_ref, z1_ref, z2_ref, w_ref, g_ref, b_ref,
                                    m_ref, o_ref, *, inv_count, eps):
    """3x3 strided conv: one height-gathered flattened buffer per vertical tap.

    Only the ho needed output rows are computed (width positions are still
    dense within each row and masked/discarded), so matmul FLOPs scale with
    the real output height instead of the full padded grid.
    """
    t_rows = o_ref.shape[0]
    zs = (z0_ref, z1_ref, z2_ref)
    acc = None
    for i in range(3):
        for j in range(3):
            part = jnp.dot(zs[i][pl.ds(j, t_rows), :],
                           w_ref[i * 3 + j],
                           preferred_element_type=jnp.float32)
            acc = part if acc is None else acc + part
    y = _bn_masked(acc, m_ref[...], g_ref[...], b_ref[...], inv_count, eps)
    o_ref[...] = jnp.maximum(y, 0.0).astype(o_ref.dtype)


# ---------------------------------------------------------------------------
# Wrappers (plain-JAX layout plumbing only; no compute here)
# ---------------------------------------------------------------------------

def _pad_vec(v, cp):
    v = v.reshape(1, -1).astype(jnp.float32)
    return jnp.pad(v, ((0, 0), (0, cp - v.shape[1])))


def _conv1x1_bn(x2d, w, g, b, *, relu, out_dtype):
    """x2d: (M, Kp) bf16 channel-padded. w: (K, C) unpadded f32."""
    m, kp = x2d.shape
    k, c = w.shape
    cp = _round_up(c, _LANE)
    wpad = jnp.pad(w, ((0, kp - k), (0, cp - c))).astype(jnp.bfloat16)
    gp, bp = _pad_vec(g, cp), _pad_vec(b, cp)
    return pl.pallas_call(
        functools.partial(_conv1x1_bn_kernel, relu=relu, eps=_EPS),
        grid=(cp // _LANE,),
        in_specs=[
            pl.BlockSpec((m, kp), lambda j: (0, 0)),
            pl.BlockSpec((kp, _LANE), lambda j: (0, j)),
            pl.BlockSpec((1, _LANE), lambda j: (0, j)),
            pl.BlockSpec((1, _LANE), lambda j: (0, j)),
        ],
        out_specs=pl.BlockSpec((m, _LANE), lambda j: (0, j)),
        out_shape=jax.ShapeDtypeStruct((m, cp), out_dtype),
        compiler_params=_compiler_params(),
    )(x2d, wpad, gp, bp)


def _conv1x1_bn_add_relu(x2d, w, g, b, identity):
    m, kp = x2d.shape
    k, c = w.shape
    cp = _round_up(c, _LANE)
    wpad = jnp.pad(w, ((0, kp - k), (0, cp - c))).astype(jnp.bfloat16)
    gp, bp = _pad_vec(g, cp), _pad_vec(b, cp)
    return pl.pallas_call(
        functools.partial(_conv1x1_bn_add_relu_kernel, eps=_EPS),
        grid=(cp // _LANE,),
        in_specs=[
            pl.BlockSpec((m, kp), lambda j: (0, 0)),
            pl.BlockSpec((kp, _LANE), lambda j: (0, j)),
            pl.BlockSpec((1, _LANE), lambda j: (0, j)),
            pl.BlockSpec((1, _LANE), lambda j: (0, j)),
            pl.BlockSpec((m, _LANE), lambda j: (0, j)),
        ],
        out_specs=pl.BlockSpec((m, _LANE), lambda j: (0, j)),
        out_shape=jax.ShapeDtypeStruct((m, cp), jnp.float32),
        compiler_params=_compiler_params(),
    )(x2d, wpad, gp, bp, identity)


def _conv1x1_bn_ds_add_relu(x2d, w, g, b, xd2d, wd, gd, bd):
    m, kp = x2d.shape
    k, c = w.shape
    cp = _round_up(c, _LANE)
    kdp = xd2d.shape[1]
    wpad = jnp.pad(w, ((0, kp - k), (0, cp - c))).astype(jnp.bfloat16)
    wdpad = jnp.pad(wd, ((0, kdp - wd.shape[0]), (0, cp - wd.shape[1]))).astype(jnp.bfloat16)
    gp, bp = _pad_vec(g, cp), _pad_vec(b, cp)
    gdp, bdp = _pad_vec(gd, cp), _pad_vec(bd, cp)
    return pl.pallas_call(
        functools.partial(_conv1x1_bn_ds_add_relu_kernel, eps=_EPS),
        grid=(cp // _LANE,),
        in_specs=[
            pl.BlockSpec((m, kp), lambda j: (0, 0)),
            pl.BlockSpec((kp, _LANE), lambda j: (0, j)),
            pl.BlockSpec((1, _LANE), lambda j: (0, j)),
            pl.BlockSpec((1, _LANE), lambda j: (0, j)),
            pl.BlockSpec((m, kdp), lambda j: (0, 0)),
            pl.BlockSpec((kdp, _LANE), lambda j: (0, j)),
            pl.BlockSpec((1, _LANE), lambda j: (0, j)),
            pl.BlockSpec((1, _LANE), lambda j: (0, j)),
        ],
        out_specs=pl.BlockSpec((m, _LANE), lambda j: (0, j)),
        out_shape=jax.ShapeDtypeStruct((m, cp), jnp.float32),
        compiler_params=_compiler_params(),
    )(x2d, wpad, gp, bp, xd2d, wdpad, gdp, bdp)


def _conv3x3_weights(w, cp, cop):
    cin, cout = w.shape[2], w.shape[3]
    return jnp.pad(w.reshape(9, cin, cout),
                   ((0, 0), (0, cp - cin), (0, cop - cout))).astype(jnp.bfloat16)


def _conv3x3_bn_relu_s1(t1, w, g, b):
    """Stride-1 path: single spatially-padded, row-flattened buffer."""
    n, h, wsp, cp = t1.shape
    cout = w.shape[3]
    cop = _round_up(cout, _LANE)

    xp = jnp.pad(t1, ((0, 0), (1, 1), (1, 1), (0, 0)))
    hp, wpd = h + 2, wsp + 2
    n_rows = n * hp * wpd
    t_rows = _round_up(n_rows, 8)
    z_rows = t_rows + 2 * wpd + 2
    z = jnp.pad(xp.reshape(n_rows, cp), ((0, z_rows - n_rows), (0, 0)))

    wk = _conv3x3_weights(w, cp, cop)
    gp, bp = _pad_vec(g, cop), _pad_vec(b, cop)

    # Validity mask on the padded output grid: real output positions only.
    rh = jnp.arange(hp)
    rw = jnp.arange(wpd)
    mimg = ((rh < h)[:, None] & (rw < wsp)[None, :]).astype(jnp.float32).reshape(-1)
    mask = jnp.pad(jnp.tile(mimg, n), (0, t_rows - n_rows)).reshape(t_rows, 1)

    out = pl.pallas_call(
        functools.partial(_conv3x3_bn_relu_kernel, pitch=wpd,
                          inv_count=1.0 / float(n * h * wsp), eps=_EPS),
        grid=(cop // _LANE,),
        in_specs=[
            pl.BlockSpec((z_rows, cp), lambda j: (0, 0)),
            pl.BlockSpec((9, cp, _LANE), lambda j: (0, 0, j)),
            pl.BlockSpec((1, _LANE), lambda j: (0, j)),
            pl.BlockSpec((1, _LANE), lambda j: (0, j)),
            pl.BlockSpec((t_rows, 1), lambda j: (0, 0)),
        ],
        out_specs=pl.BlockSpec((t_rows, _LANE), lambda j: (0, j)),
        out_shape=jax.ShapeDtypeStruct((t_rows, cop), jnp.bfloat16),
        compiler_params=_compiler_params(),
    )(z, wk, gp, bp, mask)

    out = out[:n_rows].reshape(n, hp, wpd, cop)
    return out[:, :h, :wsp, :]


def _conv3x3_bn_relu_strided(t1, w, g, b, *, stride):
    """stride > 1 path: three height-strided gathered buffers (one per tap row),
    so matmul FLOPs scale with the real output height."""
    n, h, wsp, cp = t1.shape
    cout = w.shape[3]
    cop = _round_up(cout, _LANE)
    ho = (h - 1) // stride + 1
    wo = (wsp - 1) // stride + 1
    wpd = wsp + 2

    xp = jnp.pad(t1, ((0, 0), (1, 1), (1, 1), (0, 0)))
    n_rows = n * ho * wpd
    t_rows = _round_up(n_rows, 8)
    z_rows = t_rows + 8

    def make_z(i):
        zi = xp[:, i::stride, :, :][:, :ho, :, :].reshape(n_rows, cp)
        return jnp.pad(zi, ((0, z_rows - n_rows), (0, 0)))

    z0, z1, z2 = make_z(0), make_z(1), make_z(2)

    wk = _conv3x3_weights(w, cp, cop)
    gp, bp = _pad_vec(g, cop), _pad_vec(b, cop)

    rw = jnp.arange(wpd)
    mrow = ((rw < wsp) & (rw % stride == 0)).astype(jnp.float32)
    mask = jnp.pad(jnp.tile(mrow, n * ho), (0, t_rows - n_rows)).reshape(t_rows, 1)

    out = pl.pallas_call(
        functools.partial(_conv3x3_bn_relu_strided_kernel,
                          inv_count=1.0 / float(n * ho * wo), eps=_EPS),
        grid=(cop // _LANE,),
        in_specs=[
            pl.BlockSpec((z_rows, cp), lambda j: (0, 0)),
            pl.BlockSpec((z_rows, cp), lambda j: (0, 0)),
            pl.BlockSpec((z_rows, cp), lambda j: (0, 0)),
            pl.BlockSpec((9, cp, _LANE), lambda j: (0, 0, j)),
            pl.BlockSpec((1, _LANE), lambda j: (0, j)),
            pl.BlockSpec((1, _LANE), lambda j: (0, j)),
            pl.BlockSpec((t_rows, 1), lambda j: (0, 0)),
        ],
        out_specs=pl.BlockSpec((t_rows, _LANE), lambda j: (0, j)),
        out_shape=jax.ShapeDtypeStruct((t_rows, cop), jnp.bfloat16),
        compiler_params=_compiler_params(),
    )(z0, z1, z2, wk, gp, bp, mask)

    out = out[:n_rows].reshape(n, ho, wpd, cop)
    return out[:, :, ::stride, :][:, :, :wo, :]


def _conv3x3_bn_relu(t1, w, g, b, *, stride):
    if stride == 1:
        return _conv3x3_bn_relu_s1(t1, w, g, b)
    return _conv3x3_bn_relu_strided(t1, w, g, b, stride=stride)


# ---------------------------------------------------------------------------
# Block forward (matches ResNetBlock.forward), NCHW in / NCHW out
# ---------------------------------------------------------------------------

def resnet_block_forward(x_nchw, params):
    stride = int(params["stride"])
    x = jnp.transpose(x_nchw, (0, 2, 3, 1)).astype(jnp.float32)     # NHWC
    n, h, wsp, cin = x.shape
    cinp = _round_up(cin, _LANE)
    cexp = params["w3"].shape[1]

    xpad = jnp.pad(x, ((0, 0), (0, 0), (0, 0), (0, cinp - cin)))    # lane pad
    x2d = xpad.reshape(n * h * wsp, cinp).astype(jnp.bfloat16)

    # conv1 (1x1) + bn1 + relu
    t1 = _conv1x1_bn(x2d, params["w1"], params["g1"], params["b1"],
                     relu=True, out_dtype=jnp.bfloat16)
    coutp = t1.shape[1]
    t1 = t1.reshape(n, h, wsp, coutp)

    # conv2 (3x3, stride) + bn2 + relu
    t2 = _conv3x3_bn_relu(t1, params["w2"], params["g2"], params["b2"],
                          stride=stride)
    ho, wo = t2.shape[1], t2.shape[2]
    m = n * ho * wo
    x3 = t2.reshape(m, coutp)

    # conv3 (1x1) + bn3, fused with the residual branch and the final relu
    if "wd" in params:
        xd = xpad[:, ::stride, ::stride, :][:, :ho, :wo, :]
        xd2d = xd.reshape(m, cinp).astype(jnp.bfloat16)
        out = _conv1x1_bn_ds_add_relu(
            x3, params["w3"], params["g3"], params["b3"],
            xd2d, params["wd"], params["gd"], params["bd"])
    else:
        identity = xpad.reshape(m, cinp)   # stride == 1 and cin == cexp here
        out = _conv1x1_bn_add_relu(
            x3, params["w3"], params["g3"], params["b3"], identity)

    out = out.reshape(n, ho, wo, out.shape[1])[:, :, :, :cexp]
    return jnp.transpose(out, (0, 3, 1, 2))


# ---------------------------------------------------------------------------
# Pure-JAX reference (f32) of the same module, for verification
# ---------------------------------------------------------------------------

def _ref_conv(x, w, stride, pad):
    return jax.lax.conv_general_dilated(
        x, w, window_strides=(stride, stride),
        padding=[(pad, pad), (pad, pad)],
        dimension_numbers=("NHWC", "HWIO", "NHWC"))


def _ref_bn(x, g, b, eps=_EPS):
    mean = jnp.mean(x, axis=(0, 1, 2), keepdims=True)
    var = jnp.mean(jnp.square(x - mean), axis=(0, 1, 2), keepdims=True)
    return (x - mean) * jax.lax.rsqrt(var + eps) * g.reshape(1, 1, 1, -1) \
        + b.reshape(1, 1, 1, -1)


def resnet_block_reference(x_nchw, p):
    s = int(p["stride"])
    x = jnp.transpose(x_nchw, (0, 2, 3, 1)).astype(jnp.float32)
    cin = x.shape[-1]
    cout = p["w1"].shape[1]
    out = jax.nn.relu(_ref_bn(_ref_conv(x, p["w1"].reshape(1, 1, cin, cout), 1, 0),
                              p["g1"], p["b1"]))
    out = jax.nn.relu(_ref_bn(_ref_conv(out, p["w2"], s, 1), p["g2"], p["b2"]))
    out = _ref_bn(_ref_conv(out, p["w3"].reshape(1, 1, cout, -1), 1, 0),
                  p["g3"], p["b3"])
    if "wd" in p:
        identity = _ref_bn(_ref_conv(x, p["wd"].reshape(1, 1, cin, -1), s, 0),
                           p["gd"], p["bd"])
    else:
        identity = x
    out = jax.nn.relu(out + identity)
    return jnp.transpose(out, (0, 3, 1, 2))


# ---------------------------------------------------------------------------
# Deterministic parameter initialization (shapes dictated by the nn.Module)
# ---------------------------------------------------------------------------

def _conv_init(key, kh, kw, cin, cout):
    fan_in = kh * kw * cin
    return (jax.random.normal(key, (kh, kw, cin, cout), jnp.float32)
            * jnp.sqrt(2.0 / fan_in))


def _bn_init(key, c):
    k1, k2 = jax.random.split(key)
    gamma = 1.0 + 0.1 * jax.random.normal(k1, (c,), jnp.float32)
    beta = 0.1 * jax.random.normal(k2, (c,), jnp.float32)
    return gamma, beta


def init_block_params(key, in_channels, out_channels, stride):
    cexp = out_channels * 4
    ks = jax.random.split(key, 8)
    p = {"stride": stride}
    p["w1"] = _conv_init(ks[0], 1, 1, in_channels, out_channels).reshape(in_channels, out_channels)
    p["g1"], p["b1"] = _bn_init(ks[1], out_channels)
    p["w2"] = _conv_init(ks[2], 3, 3, out_channels, out_channels)
    p["g2"], p["b2"] = _bn_init(ks[3], out_channels)
    p["w3"] = _conv_init(ks[4], 1, 1, out_channels, cexp).reshape(out_channels, cexp)
    p["g3"], p["b3"] = _bn_init(ks[5], cexp)
    if stride != 1 or in_channels != cexp:
        p["wd"] = _conv_init(ks[6], 1, 1, in_channels, cexp).reshape(in_channels, cexp)
        p["gd"], p["bd"] = _bn_init(ks[7], cexp)
    return p


if __name__ == "__main__":
    key = jax.random.PRNGKey(0)
    kx, k1, k2, k3 = jax.random.split(key, 4)
    x = jax.random.normal(kx, (2, 64, 16, 16), jnp.float32)   # NCHW, like PyTorch

    # Three block configurations covering every branch of the module:
    p1 = init_block_params(k1, 64, 64, stride=1)      # 1x1 downsample (64 != 256)
    p2 = init_block_params(k2, 256, 64, stride=1)     # pure identity skip
    p3 = init_block_params(k3, 256, 128, stride=2)    # strided downsample

    y = x
    for p in (p1, p2, p3):
        y_ref = resnet_block_reference(y, p)          # f32 reference, same input
        y = resnet_block_forward(y, p)                # Pallas (bf16 MXU) path
        y = jax.block_until_ready(y)
        assert bool(jnp.all(jnp.isfinite(y)))
        err = float(jnp.max(jnp.abs(y - y_ref)))
        assert err < 0.5, f"mismatch vs reference: {err}"

    assert y.shape == (2, 512, 8, 8), y.shape
    print("KERNEL_OK")
</pallas_src>

<mosaic_0001>
module attributes {stable_mosaic.version = 11 : i64} {
  func.func @_conv1x1_bn_kernel(%arg0: i32, %arg1: memref<512x128xbf16, #tpu.memory_space<vmem>>, %arg2: memref<128x128xbf16, #tpu.memory_space<vmem>>, %arg3: memref<1x128xf32, #tpu.memory_space<vmem>>, %arg4: memref<1x128xf32, #tpu.memory_space<vmem>>, %arg5: memref<512x128xbf16, #tpu.memory_space<vmem>>) attributes {dimension_semantics = [#tpu.dimension_semantics<parallel>], iteration_bounds = array<i64: 1>, scalar_prefetch = 0 : i64, scratch_operands = 0 : i64, tpu.core_type = #tpu.core_type<tc>, window_params = [{pipeline_mode = #tpu.pipeline_mode<synchronous>, transform_indices = @transform_0, window_bounds = array<i64: 512, 128>}, {transform_indices = @transform_1, window_bounds = array<i64: 128, 128>}, {transform_indices = @transform_2, window_bounds = array<i64: 1, 128>}, {transform_indices = @transform_3, window_bounds = array<i64: 1, 128>}, {transform_indices = @transform_4, window_bounds = array<i64: 512, 128>}]} {
    %c0 = arith.constant 0 : index
    %c0_0 = arith.constant 0 : index
    %0 = vector.load %arg1[%c0, %c0_0] : memref<512x128xbf16, #tpu.memory_space<vmem>>, vector<512x128xbf16>
    %c0_1 = arith.constant 0 : index
    %c0_2 = arith.constant 0 : index
    %1 = vector.load %arg2[%c0_1, %c0_2] : memref<128x128xbf16, #tpu.memory_space<vmem>>, vector<128x128xbf16>
    %cst = arith.constant dense<0.000000e+00> : vector<512x128xf32>
    %2 = tpu.matmul %0, %1, %cst {dimension_numbers = #tpu.dot_dimension_numbers<[1], [0], [0], [1], [0, 0, 1, 1], [], []>} : vector<512x128xbf16>, vector<128x128xbf16>, vector<512x128xf32> -> vector<512x128xf32>
    %c0_3 = arith.constant 0 : index
    %c0_4 = arith.constant 0 : index
    %3 = vector.load %arg3[%c0_3, %c0_4] : memref<1x128xf32, #tpu.memory_space<vmem>>, vector<1x128xf32>
    %c0_5 = arith.constant 0 : index
    %c0_6 = arith.constant 0 : index
    %4 = vector.load %arg4[%c0_5, %c0_6] : memref<1x128xf32, #tpu.memory_space<vmem>>, vector<1x128xf32>
    %cst_7 = arith.constant dense<0.000000e+00> : vector<128xf32>
    %5 = vector.multi_reduction <add>, %2, %cst_7 [0] : vector<512x128xf32> to vector<128xf32>
    %6 = vector.shape_cast %5 : vector<128xf32> to vector<1x128xf32>
    %cst_8 = arith.constant 5.120000e+02 : f32
    %7 = vector.broadcast %cst_8 : f32 to vector<1x128xf32>
    %8 = arith.divf %6, %7 : vector<1x128xf32>
    %9 = vector.broadcast %8 : vector<1x128xf32> to vector<512x128xf32>
    %10 = arith.subf %2, %9 : vector<512x128xf32>
    %11 = arith.mulf %10, %10 : vector<512x128xf32>
    %cst_9 = arith.constant dense<0.000000e+00> : vector<128xf32>
    %12 = vector.multi_reduction <add>, %11, %cst_9 [0] : vector<512x128xf32> to vector<128xf32>
    %13 = vector.shape_cast %12 : vector<128xf32> to vector<1x128xf32>
    %cst_10 = arith.constant 5.120000e+02 : f32
    %14 = vector.broadcast %cst_10 : f32 to vector<1x128xf32>
    %15 = arith.divf %13, %14 : vector<1x128xf32>
    %cst_11 = arith.constant 9.99999974E-6 : f32
    %16 = vector.broadcast %cst_11 : f32 to vector<1x128xf32>
    %17 = arith.addf %15, %16 : vector<1x128xf32>
    %18 = math.rsqrt %17 : vector<1x128xf32>
    %19 = vector.broadcast %18 : vector<1x128xf32> to vector<512x128xf32>
    %20 = arith.mulf %10, %19 : vector<512x128xf32>
    %21 = vector.broadcast %3 : vector<1x128xf32> to vector<512x128xf32>
    %22 = arith.mulf %20, %21 : vector<512x128xf32>
    %23 = vector.broadcast %4 : vector<1x128xf32> to vector<512x128xf32>
    %24 = arith.addf %22, %23 : vector<512x128xf32>
    %cst_12 = arith.constant 0.000000e+00 : f32
    %25 = vector.broadcast %cst_12 : f32 to vector<512x128xf32>
    %26 = arith.maximumf %24, %25 : vector<512x128xf32>
    %27 = arith.truncf %26 : vector<512x128xf32> to vector<512x128xbf16>
    %c0_13 = arith.constant 0 : index
    %c0_14 = arith.constant 0 : index
    %28 = vector.load %arg5[%c0_13, %c0_14] : memref<512x128xbf16, #tpu.memory_space<vmem>>, vector<512x128xbf16>
    tpu.vector_store %arg5[%c0_13, %c0_14], %27 {strides = array<i32>} : memref<512x128xbf16, #tpu.memory_space<vmem>>, vector<512x128xbf16>,
    return
  }
  func.func @transform_0(%arg0: i32) -> (i32, i32) {
    %c0_i32 = arith.constant 0 : i32
    %c0_i32_0 = arith.constant 0 : i32
    %c0_i32_1 = arith.constant 0 : i32
    return %c0_i32, %c0_i32_0 : i32, i32
  }
  func.func @transform_1(%arg0: i32) -> (i32, i32) {
    %c0_i32 = arith.constant 0 : i32
    %c0_i32_0 = arith.constant 0 : i32
    return %c0_i32, %arg0 : i32, i32
  }
  func.func @transform_2(%arg0: i32) -> (i32, i32) {
    %c0_i32 = arith.constant 0 : i32
    %c0_i32_0 = arith.constant 0 : i32
    return %c0_i32, %arg0 : i32, i32
  }
  func.func @transform_3(%arg0: i32) -> (i32, i32) {
    %c0_i32 = arith.constant 0 : i32
    %c0_i32_0 = arith.constant 0 : i32
    return %c0_i32, %arg0 : i32, i32
  }
  func.func @transform_4(%arg0: i32) -> (i32, i32) {
    %c0_i32 = arith.constant 0 : i32
    %c0_i32_0 = arith.constant 0 : i32
    return %c0_i32, %arg0 : i32, i32
  }
}

</mosaic_0001>

<bundles_post_ra>
// kernel: tpu_custom_call.1
= control target key start
LH: loop header
LB: loop body
LE: loop exit
PB: predicated region body
PF: predicated region fallthrough
CT: control target
= control target key end

     0   :  { %9 = vsyncpa [#allocation3], 0  ;;  %s2907_s0 = inlined_call_operand.hbm [shape: bf16[512,128], index: 0, kind: input, shape index: {}]   ;;  %s2908_s1 = inlined_call_operand.hbm [shape: bf16[128,128], index: 1, kind: input, shape index: {}]   ;;  %s2909_s2 = inlined_call_operand.vmem [shape: f32[1,128], index: 2, kind: input, shape index: {}]   ;;  %s2910_s3 = inlined_call_operand.vmem [shape: f32[1,128], index: 3, kind: input, shape index: {}]   ;;  %s2911_s4 = inlined_call_operand.hbm [shape: bf16[512,128], index: 4, kind: output, shape index: {}]  }
   0x1   :  { %10 = vsyncpa [#allocation6], 0 }
   0x2   :  { %11 = vsyncpa [#allocation4], 0  ;;  %s16_s17 = sshll.u32 %s2907_s0, 4  ;;  %s1742_s18 = smov [#allocation2]   ;;  %s17_s17 = int_to_ptr.hbm [resolvable:$true] %s16_s17 }
   0x3   :  { %s18_s19 = sshll.u32 %s1742_s18, 4  ;;  %s29_s22 = sshll.u32 %s2908_s1, 4  ;;  %s19_s19 = int_to_ptr.vmem [resolvable:$true] %s18_s19  ;;  %s30_s22 = int_to_ptr.hbm [resolvable:$true] %s29_s22 }
   0x4   :  { %s1743_s23 = smov 64   ;;  %s1744_s24 = smov 4  }
   0x5   :  { %24 = dma.hbm_to_vmem [thread:$0]  %s17_s17, 4096, %s19_s19, [#allocation3], %s1743_s23, %s1743_s23, %s1744_s24  }
   0x6   :  { %s1745_s25 = smov [#allocation5]  }
   0x7   :  { %s31_s26 = sshll.u32 %s1745_s25, 4  ;;  %s32_s26 = int_to_ptr.vmem [resolvable:$true] %s31_s26 }
   0x8   :  { %37 = dma.hbm_to_vmem [thread:$0]  %s30_s22, 1024, %s32_s26, [#allocation6], %s1743_s23, %s1743_s23, %s1744_s24  }
   0x9   :  { %1736 = dma.done.wait [#allocation3], 4096  }
   0xa   :  { %1737 = vsyncadd [#allocation3], 4294963200 }
   0xb   :  { %1738 = dma.done.wait [#allocation6], 1024  }
   0xc   :  { %1739 = vsyncadd [#allocation6], 4294966272  ;;  %v1436_v0 = vld [vmem:[#allocation5 + $0x38] sm:$0xff]  ;;  %v1435_v1 = vld [vmem:[#allocation5 + $0x30] sm:$0xff]  ;;  %s1223_s5 = sshll.u32 %s2911_s4, 4  ;;  %s1224_s5 = int_to_ptr.hbm [resolvable:$true] %s1223_s5 }
   0xd   :  { %370 = vmatpush.bf16.msra.mxu0 %v1436_v0  ;;  %1628 = vmatpush.bf16.msra.mxu1 %v1436_v0  ;;  %v1434_v2 = vld [vmem:[#allocation5 + $0x28] sm:$0xff]  ;;  %v1433_v3 = vld [vmem:[#allocation5 + $0x20] sm:$0xff]  ;;  %v1432_v4 = vld [vmem:[#allocation5 + $0x18] sm:$0xff] }
   0xe   :  { %1629 = vmatpush.bf16.msra.mxu2 %v1436_v0  ;;  %1630 = vmatpush.bf16.msra.mxu3 %v1436_v0  ;;  %v1431_v5 = vld [vmem:[#allocation5 + $0x10] sm:$0xff]  ;;  %v1430_v6 = vld [vmem:[#allocation5 + $0x8] sm:$0xff]  ;;  %v1429_v7 = vld [vmem:[#allocation5] sm:$0xff] }
   0xf   :  { %v1397_v8 = vld [vmem:[#allocation2] sm:$0xff]  ;;  %v1398_v10 = vld [vmem:[#allocation2 + $0x8] sm:$0xff]  ;;  %v1399_v13 = vld [vmem:[#allocation2 + $0x10] sm:$0xff] }
  0x10   :  { %v1405_v9 = vld [vmem:[#allocation2 + $0x40] sm:$0xff]  ;;  %v1406_v11 = vld [vmem:[#allocation2 + $0x48] sm:$0xff]  ;;  %v1407_v14 = vld [vmem:[#allocation2 + $0x50] sm:$0xff] }
  0x11   :  { %371 = vmatpush.bf16.msra.mxu0 %v1435_v1  ;;  %1631 = vmatpush.bf16.msra.mxu1 %v1435_v1  ;;  %v1413_v12 = vld [vmem:[#allocation2 + $0x80] sm:$0xff]  ;;  %v1414_v15 = vld [vmem:[#allocation2 + $0x88] sm:$0xff]  ;;  %v1400_v16 = vld [vmem:[#allocation2 + $0x18] sm:$0xff] }
  0x12   :  { %1632 = vmatpush.bf16.msra.mxu2 %v1435_v1  ;;  %1633 = vmatpush.bf16.msra.mxu3 %v1435_v1  ;;  %v1408_v17 = vld [vmem:[#allocation2 + $0x58] sm:$0xff]  ;;  %v1415_v18 = vld [vmem:[#allocation2 + $0x90] sm:$0xff]  ;;  %v1421_v19 = vld [vmem:[#allocation2 + $0xc0] sm:$0xff] }
  0x13   :  { %v1401_v20 = vld [vmem:[#allocation2 + $0x20] sm:$0xff]  ;;  %v1416_v22 = vld [vmem:[#allocation2 + $0x98] sm:$0xff]  ;;  %v1422_v23 = vld [vmem:[#allocation2 + $0xc8] sm:$0xff] }
  0x14   :  { %v1409_v21 = vld [vmem:[#allocation2 + $0x60] sm:$0xff]  ;;  %v1402_v24 = vld [vmem:[#allocation2 + $0x28] sm:$0xff]  ;;  %v1423_v27 = vld [vmem:[#allocation2 + $0xd0] sm:$0xff] }
  0x15   :  { %372 = vmatpush.bf16.msra.mxu0 %v1434_v2  ;;  %1634 = vmatpush.bf16.msra.mxu1 %v1434_v2  ;;  %v1410_v25 = vld [vmem:[#allocation2 + $0x68] sm:$0xff]  ;;  %v1417_v26 = vld [vmem:[#allocation2 + $0xa0] sm:$0xff]  ;;  %v1403_v28 = vld [vmem:[#allocation2 + $0x30] sm:$0xff] }
  0x16   :  { %1635 = vmatpush.bf16.msra.mxu2 %v1434_v2  ;;  %1636 = vmatpush.bf16.msra.mxu3 %v1434_v2  ;;  %v1411_v29 = vld [vmem:[#allocation2 + $0x70] sm:$0xff]  ;;  %v1418_v30 = vld [vmem:[#allocation2 + $0xa8] sm:$0xff]  ;;  %v1424_v31 = vld [vmem:[#allocation2 + $0xd8] sm:$0xff] }
  0x17   :  { %v1404_v32 = vld [vmem:[#allocation2 + $0x38] sm:$0xff]  ;;  %v1419_v34 = vld [vmem:[#allocation2 + $0xb0] sm:$0xff]  ;;  %v1425_v35 = vld [vmem:[#allocation2 + $0xe0] sm:$0xff] }
  0x18   :  { %v1412_v33 = vld [vmem:[#allocation2 + $0x78] sm:$0xff]  ;;  %v1426_v38 = vld [vmem:[#allocation2 + $0xe8] sm:$0xff]  ;;  %v1427_v43 = vld [vmem:[#allocation2 + $0xf0] sm:$0xff] }
  0x19   :  { %373 = vmatpush.bf16.msra.mxu0 %v1433_v3  ;;  %1637 = vmatpush.bf16.msra.mxu1 %v1433_v3  ;;  %v1420_v37 = vld [vmem:[#allocation2 + $0xb8] sm:$0xff] }
  0x1a   :  { %1638 = vmatpush.bf16.msra.mxu2 %v1433_v3  ;;  %1639 = vmatpush.bf16.msra.mxu3 %v1433_v3  ;;  %v1428_v48 = vld [vmem:[#allocation2 + $0xf8] sm:$0xff] }
  0x1d   :  { %374 = vmatpush.bf16.msra.mxu0 %v1432_v4  ;;  %1640 = vmatpush.bf16.msra.mxu1 %v1432_v4 }
  0x1e   :  { %1641 = vmatpush.bf16.msra.mxu2 %v1432_v4  ;;  %1642 = vmatpush.bf16.msra.mxu3 %v1432_v4 }
  0x21   :  { %375 = vmatpush.bf16.msra.mxu0 %v1431_v5  ;;  %1643 = vmatpush.bf16.msra.mxu1 %v1431_v5 }
  0x22   :  { %1644 = vmatpush.bf16.msra.mxu2 %v1431_v5  ;;  %1645 = vmatpush.bf16.msra.mxu3 %v1431_v5 }
  0x25   :  { %376 = vmatpush.bf16.msra.mxu0 %v1430_v6  ;;  %1646 = vmatpush.bf16.msra.mxu1 %v1430_v6 }
  0x26   :  { %1647 = vmatpush.bf16.msra.mxu2 %v1430_v6  ;;  %1648 = vmatpush.bf16.msra.mxu3 %v1430_v6 }
  0x29   :  { %377 = vmatpush.bf16.msra.mxu0 %v1429_v7  ;;  %1649 = vmatpush.bf16.msra.mxu1 %v1429_v7 }
  0x2a   :  { %1650 = vmatpush.bf16.msra.mxu2 %v1429_v7  ;;  %1651 = vmatpush.bf16.msra.mxu3 %v1429_v7 }
  0x2c   :  { %378 = vmatmul.bf16.vlgmr.msra.gmra.mxu0 %v1397_v8  ;;  %418 = vmatmul.bf16.vlgmr.msra.gmra.mxu1 %v1405_v9 }
  0x2d   :  { %458 = vmatmul.bf16.vlgmr.msra.gmra.mxu2 %v1413_v12  ;;  %498 = vmatmul.bf16.vlgmr.msra.gmra.mxu3 %v1421_v19 }
  0x3c   :  { %383 = vmatmul.bf16.gmra.mxu0 %v1398_v10  ;;  %423 = vmatmul.bf16.gmra.mxu1 %v1406_v11 }
  0x3d   :  { %463 = vmatmul.bf16.gmra.mxu2 %v1414_v15  ;;  %503 = vmatmul.bf16.gmra.mxu3 %v1422_v23 }
  0x4c   :  { %388 = vmatmul.bf16.gmra.mxu0 %v1399_v13  ;;  %428 = vmatmul.bf16.gmra.mxu1 %v1407_v14 }
  0x4d   :  { %468 = vmatmul.bf16.gmra.mxu2 %v1415_v18  ;;  %508 = vmatmul.bf16.gmra.mxu3 %v1423_v27 }
  0x5c   :  { %393 = vmatmul.bf16.gmra.mxu0 %v1400_v16  ;;  %433 = vmatmul.bf16.gmra.mxu1 %v1408_v17 }
  0x5d   :  { %473 = vmatmul.bf16.gmra.mxu2 %v1416_v22  ;;  %513 = vmatmul.bf16.gmra.mxu3 %v1424_v31 }
  0x6c   :  { %398 = vmatmul.bf16.gmra.mxu0 %v1401_v20  ;;  %438 = vmatmul.bf16.gmra.mxu1 %v1409_v21 }
  0x6d   :  { %478 = vmatmul.bf16.gmra.mxu2 %v1417_v26  ;;  %518 = vmatmul.bf16.gmra.mxu3 %v1425_v35 }
  0x7c   :  { %403 = vmatmul.bf16.gmra.mxu0 %v1402_v24  ;;  %443 = vmatmul.bf16.gmra.mxu1 %v1410_v25 }
  0x7d   :  { %483 = vmatmul.bf16.gmra.mxu2 %v1418_v30  ;;  %523 = vmatmul.bf16.gmra.mxu3 %v1426_v38 }
  0x8c   :  { %408 = vmatmul.bf16.gmra.mxu0 %v1403_v28  ;;  %448 = vmatmul.bf16.gmra.mxu1 %v1411_v29 }
  0x8d   :  { %488 = vmatmul.bf16.gmra.mxu2 %v1419_v34  ;;  %528 = vmatmul.bf16.gmra.mxu3 %v1427_v43 }
  0x9c   :  { %413 = vmatmul.bf16.gmra.mxu0 %v1404_v32  ;;  %453 = vmatmul.bf16.gmra.mxu1 %v1412_v33 }
  0x9d   :  { %493 = vmatmul.bf16.gmra.mxu2 %v1420_v37  ;;  %533 = vmatmul.bf16.gmra.mxu3 %v1428_v48 }
  0xa9   :  { %v1785_v36 = vpop.f32.mrf.mxu0  ;;  %v1787_v39 = vpop.f32.mrf.mxu1 }
  0xb0   :  { %v1803_v49 = vpop.f32.mrf.mxu2  ;;  %v1825_v60 = vpop.f32.mrf.mxu3 }
  0xb1   :  { %v1789_v40 = vpop.f32.mrf.mxu0  ;;  %v1791_v41 = vpop.f32.mrf.mxu1  ;;  %2951 = vst [vmem:[#allocation11_spill] sm:$0xff] %v1803_v49 }
  0xb2   :  { %2953 = vst [vmem:[#allocation13_spill] sm:$0xff] %v1825_v60  ;;  %v541_v7 = vadd.f32 %v1789_v40, %v1785_v36 }
  0xb8   :  { %v1809_v52 = vpop.f32.mrf.mxu2  ;;  %v1833_v0 = vpop.f32.mrf.mxu3 }
  0xb9   :  { %v1793_v42 = vpop.f32.mrf.mxu0  ;;  %v1795_v44 = vpop.f32.mrf.mxu1  ;;  %2952 = vst [vmem:[#allocation12_spill] sm:$0xff] %v1809_v52 }
  0xba   :  { %v542_v9 = vadd.f32 %v541_v7, %v1793_v42 }
  0xc0   :  { %v1815_v55 = vpop.f32.mrf.mxu2  ;;  %v1841_v4 = vpop.f32.mrf.mxu3 }
  0xc1   :  { %v1797_v45 = vpop.f32.mrf.mxu0  ;;  %v1801_v47 = vpop.f32.mrf.mxu1 }
  0xc2   :  { %v543_v12 = vadd.f32 %v542_v9, %v1797_v45 }
  0xc8   :  { %v1823_v59 = vpop.f32.mrf.mxu2  ;;  %v1854_v11 = vpop.f32.mrf.mxu3 }
  0xc9   :  { %v1799_v46 = vpop.f32.mrf.mxu0  ;;  %v1807_v51 = vpop.f32.mrf.mxu1 }
  0xca   :  { %v544_v13 = vadd.f32 %v543_v12, %v1799_v46 }
  0xd0   :  { %v1831_v63 = vpop.f32.mrf.mxu2  ;;  %v1867_v20 = vpop.f32.mrf.mxu3 }
  0xd1   :  { %v1805_v50 = vpop.f32.mrf.mxu0  ;;  %v1813_v54 = vpop.f32.mrf.mxu1  ;;  %2957 = vst [vmem:[#allocation17_spill] sm:$0xff] %v1867_v20 }
  0xd2   :  { %v545_v14 = vadd.f32 %v544_v13, %v1805_v50 }
  0xd8   :  { %v1839_v3 = vpop.f32.mrf.mxu2  ;;  %v1880_v29 = vpop.f32.mrf.mxu3 }
  0xd9   :  { %v1811_v53 = vpop.f32.mrf.mxu0  ;;  %v1819_v57 = vpop.f32.mrf.mxu1  ;;  %2954 = vst [vmem:[#allocation14_spill] sm:$0xff] %v1839_v3 }
  0xda   :  { %v546_v16 = vadd.f32 %v545_v14, %v1811_v53  ;;  %2958 = vst [vmem:[#allocation18_spill] sm:$0xff] %v1880_v29 }
  0xe0   :  { %v1849_v8 = vpop.f32.mrf.mxu2  ;;  %v1893_v43 = vpop.f32.mrf.mxu3 }
  0xe1   :  { %v1817_v56 = vpop.f32.mrf.mxu0  ;;  %v1829_v62 = vpop.f32.mrf.mxu1  ;;  %2955 = vst [vmem:[#allocation15_spill] sm:$0xff] %v1849_v8 }
  0xe2   :  { %v547_v19 = vadd.f32 %v546_v16, %v1817_v56  ;;  %2959 = vst [vmem:[#allocation19_spill] sm:$0xff] %v1893_v43 }
  0xe8   :  { %v1864_v18 = vpop.f32.mrf.mxu2 }
  0xe9   :  { %v1821_v58 = vpop.f32.mrf.mxu0  ;;  %v1837_v2 = vpop.f32.mrf.mxu1  ;;  %2956 = vst [vmem:[#allocation16_spill] sm:$0xff] %v1864_v18 }
  0xea   :  { %v548_v21 = vadd.f32 %v547_v19, %v1821_v58  ;;  %v1904_v19 = vpop.f32.mrf.mxu3 }
  0xeb   :  { %2961 = vst [vmem:[#allocation21_spill] sm:$0xff] %v1904_v19 }
  0xf0   :  { %v1877_v27 = vpop.f32.mrf.mxu2 }
  0xf1   :  { %v1827_v61 = vpop.f32.mrf.mxu0  ;;  %v1845_v6 = vpop.f32.mrf.mxu1 }
  0xf2   :  { %v549_v22 = vadd.f32 %v548_v21, %v1827_v61 }
  0xf8   :  { %v1890_v37 = vpop.f32.mrf.mxu2 }
  0xf9   :  { %v1835_v1 = vpop.f32.mrf.mxu0  ;;  %v1859_v15 = vpop.f32.mrf.mxu1 }
  0xfa   :  { %v550_v23 = vadd.f32 %v549_v22, %v1835_v1 }
 0x100   :  { %v1901_v14 = vpop.f32.mrf.mxu2 }
 0x101   :  { %v1843_v5 = vpop.f32.mrf.mxu0  ;;  %v1874_v25 = vpop.f32.mrf.mxu1  ;;  %2960 = vst [vmem:[#allocation20_spill] sm:$0xff] %v1901_v14 }
 0x102   :  { %v551_v26 = vadd.f32 %v550_v23, %v1843_v5 }
 0x109   :  { %v1852_v10 = vpop.f32.mrf.mxu0  ;;  %v1887_v34 = vpop.f32.mrf.mxu1 }
 0x10a   :  { %v552_v28 = vadd.f32 %v551_v26, %v1852_v10 }
 0x111   :  { %v1862_v17 = vpop.f32.mrf.mxu0  ;;  %v1898_v12 = vpop.f32.mrf.mxu1 }
 0x112   :  { %v553_v30 = vadd.f32 %v552_v28, %v1862_v17 }
 0x119   :  { %v1872_v24 = vpop.f32.mrf.mxu0  ;;  %v1909_v26 = vpop.f32.mrf.mxu1 }
 0x11a   :  { %v554_v31 = vadd.f32 %v553_v30, %v1872_v24  ;;  %2962 = vst [vmem:[#allocation22_spill] sm:$0xff] %v1909_v26  ;;  %v1912_v30 = vpop.f32.mrf.mxu2 }
 0x11b   :  { %2963 = vst [vmem:[#allocation23_spill] sm:$0xff] %v1912_v30 }
 0x121   :  { %v1884_v32 = vpop.f32.mrf.mxu0 }
 0x122   :  { %v555_v33 = vadd.f32 %v554_v31, %v1884_v32 }
 0x124   :  { %v556_v35 = vadd.f32 %v555_v33, %v1787_v39  ;;  %v1915_v33 = vpop.f32.mrf.mxu3 }
 0x125   :  { %2964 = vst [vmem:[#allocation24_spill] sm:$0xff] %v1915_v33 }
 0x126   :  { %v557_v38 = vadd.f32 %v556_v35, %v1791_v41 }
 0x128   :  { %v558_v48 = vadd.f32 %v557_v38, %v1795_v44 }
 0x12a   :  { %v559_v7 = vadd.f32 %v558_v48, %v1801_v47 }
 0x12c   :  { %v560_v9 = vadd.f32 %v559_v7, %v1807_v51  ;;  %v1920_v7 = vpop.f32.mrf.mxu1 }
 0x12e   :  { %v561_v13 = vadd.f32 %v560_v9, %v1813_v54 }
 0x130   :  { %v562_v16 = vadd.f32 %v561_v13, %v1819_v57  ;;  %v1923_v13 = vpop.f32.mrf.mxu2 }
 0x132   :  { %v563_v21 = vadd.f32 %v562_v16, %v1829_v62 }
 0x134   :  { %v564_v22 = vadd.f32 %v563_v21, %v1837_v2  ;;  %v1926_v21 = vpop.f32.mrf.mxu3 }
 0x135   :  { %2965 = vst [vmem:[#allocation25_spill] sm:$0xff] %v1926_v21 }
 0x136   :  { %v565_v23 = vadd.f32 %v564_v22, %v1845_v6 }
 0x138   :  { %v566_v28 = vadd.f32 %v565_v23, %v1859_v15 }
 0x13a   :  { %v567_v31 = vadd.f32 %v566_v28, %v1874_v25 }
 0x13c   :  { %v568_v35 = vadd.f32 %v567_v31, %v1887_v34 }
 0x13e   :  { %v569_v38 = vadd.f32 %v568_v35, %v1898_v12  ;;  %v1932_v35 = vpop.f32.mrf.mxu2 }
 0x140   :  { %v570_v48 = vadd.f32 %v569_v38, %v1909_v26  ;;  %v1935_v26 = vpop.f32.mrf.mxu3 }
 0x141   :  { %2966 = vst [vmem:[#allocation26_spill] sm:$0xff] %v1935_v26 }
 0x142   :  { %v571_v9 = vadd.f32 %v570_v48, %v1920_v7 }
 0x144   :  { %v572_v16 = vadd.f32 %v571_v9, %v1803_v49 }
 0x146   :  { %v573_v22 = vadd.f32 %v572_v16, %v1809_v52  ;;  %v1941_v52 = vpop.f32.mrf.mxu2 }
 0x148   :  { %v574_v23 = vadd.f32 %v573_v22, %v1815_v55 }
 0x14a   :  { %v575_v28 = vadd.f32 %v574_v23, %v1823_v59  ;;  %v1944_v23 = vpop.f32.mrf.mxu3 }
 0x14c   :  { %v576_v31 = vadd.f32 %v575_v28, %v1831_v63 }
 0x14e   :  { %v577_v38 = vadd.f32 %v576_v31, %v1839_v3 }
 0x150   :  { %v578_v48 = vadd.f32 %v577_v38, %v1849_v8  ;;  %v496_v8 = vpop.f32.mrf.mxu2 }
 0x152   :  { %v579_v9 = vadd.f32 %v578_v48, %v1864_v18  ;;  %v1950_v18 = vpop.f32.mrf.mxu3 }
 0x153   :  { %2967 = vst [vmem:[#allocation27_spill] sm:$0xff] %v1950_v18 }
 0x154   :  { %v580_v49 = vadd.f32 %v579_v9, %v1877_v27 }
 0x156   :  { %v581_v16 = vadd.f32 %v580_v49, %v1890_v37 }
 0x158   :  { %v582_v22 = vadd.f32 %v581_v16, %v1901_v14 }
 0x15a   :  { %v583_v28 = vadd.f32 %v582_v22, %v1912_v30  ;;  %v1957_v30 = vpop.f32.mrf.mxu3 }
 0x15c   :  { %v584_v31 = vadd.f32 %v583_v28, %v1923_v13 }
 0x15e   :  { %v585_v3 = vadd.f32 %v584_v31, %v1932_v35 }
 0x160   :  { %v586_v38 = vadd.f32 %v585_v3, %v1941_v52 }
 0x162   :  { %v587_v48 = vadd.f32 %v586_v38, %v496_v8 }
 0x164   :  { %v588_v49 = vadd.f32 %v587_v48, %v1825_v60  ;;  %v1964_v60 = vpop.f32.mrf.mxu3 }
 0x166   :  { %v589_v9 = vadd.f32 %v588_v49, %v1833_v0 }
 0x168   :  { %v590_v16 = vadd.f32 %v589_v9, %v1841_v4 }
 0x16a   :  { %v591_v14 = vadd.f32 %v590_v16, %v1854_v11  ;;  %v1746_v16 = vmov 512.0  }
 0x16b   :  { %1660 = vrcp.f32 %v1746_v16 }
 0x16c   :  { %v592_v22 = vadd.f32 %v591_v14, %v1867_v20 }
 0x16e   :  { %v593_v28 = vadd.f32 %v592_v22, %v1880_v29 }
 0x170   :  { %v594_v3 = vadd.f32 %v593_v28, %v1893_v43  ;;  %v536_v43 = vpop.f32.mrf.mxu3 }
 0x172   :  { %v595_v31 = vadd.f32 %v594_v3, %v1904_v19  ;;  %v1661_v19 = vpop.eup %1660 }
 0x173   :  { %vm615_vm0 = vweird.f32 %v1661_v19 }
 0x174   :  { %v596_v38 = vadd.f32 %v595_v31, %v1915_v33 }
 0x176   :  { %v597_v48 = vadd.f32 %v596_v38, %v1926_v21  ;;  %v611_v38 = vmul.f32 512.0, %v1661_v19 }
 0x178   :  { %v598_v49 = vadd.f32 %v597_v48, %v1935_v26  ;;  %v612_v29 = vsub.f32 1.0, %v611_v38 }
 0x17a   :  { %v599_v9 = vadd.f32 %v598_v49, %v1944_v23  ;;  %v613_v48 = vmul.f32 %v1661_v19, %v612_v29 }
 0x17c   :  { %v600_v14 = vadd.f32 %v599_v9, %v1950_v18  ;;  %v614_v49 = vadd.f32 %v1661_v19, %v613_v48 }
 0x17e   :  { %v601_v22 = vadd.f32 %v600_v14, %v1957_v30  ;;  %v1971_v18 = vsel %vm615_vm0, %v1661_v19, %v614_v49 }
 0x180   :  { %v602_v28 = vadd.f32 %v601_v22, %v1964_v60 }
 0x182   :  { %v603_v3 = vadd.f32 %v602_v28, %v536_v43 }
 0x184   :  { %v604_v31 = vrot.slane %v603_v3, 4 }
 0x186   :  { %v605_v33 = vadd.f32 %v604_v31, %v603_v3 }
 0x188   :  { %v606_v21 = vrot.slane %v605_v33, 2 }
 0x18a   :  { %v607_v20 = vadd.f32 %v606_v21, %v605_v33 }
 0x18c   :  { %v608_v26 = vrot.slane %v607_v20, 1 }
 0x18e   :  { %v609_v9 = vadd.f32 %v608_v26, %v607_v20 }
 0x190   :  { %v1974_v14 = vmul.f32 %v1971_v18, %v609_v9 }
 0x192   :  { %v1977_v16 = vsub.f32 %v496_v8, %v1974_v14  ;;  %v1980_v22 = vsub.f32 %v536_v43, %v1974_v14  ;;  %v1984_v28 = vsub.f32 %v1785_v36, %v1974_v14  ;;  %v1988_v29 = vsub.f32 %v1789_v40, %v1974_v14 }
 0x193   :  { %v1992_v20 = vsub.f32 %v1793_v42, %v1974_v14  ;;  %v2000_v43 = vsub.f32 %v1797_v45, %v1974_v14  ;;  %v2004_v36 = vsub.f32 %v1799_v46, %v1974_v14  ;;  %v2010_v42 = vsub.f32 %v1805_v50, %v1974_v14 }
 0x194   :  { %2968 = vst [vmem:[#allocation28_spill] sm:$0xff] %v1977_v16  ;;  %v682_v19 = vmul.f32 %v1984_v28, %v1984_v28  ;;  %v683_v8 = vmul.f32 %v1988_v29, %v1988_v29  ;;  %v2016_v45 = vsub.f32 %v1811_v53, %v1974_v14  ;;  %v2022_v31 = vsub.f32 %v1817_v56, %v1974_v14 }
 0x195   :  { %v684_v40 = vmul.f32 %v1992_v20, %v1992_v20  ;;  %v685_v33 = vmul.f32 %v2000_v43, %v2000_v43  ;;  %v686_v46 = vmul.f32 %v2004_v36, %v2004_v36  ;;  %v687_v50 = vmul.f32 %v2010_v42, %v2010_v42 }
 0x196   :  { %v746_v26 = vadd.f32 %v683_v8, %v682_v19  ;;  %v2028_v48 = vsub.f32 %v1821_v58, %v1974_v14  ;;  %v688_v53 = vmul.f32 %v2016_v45, %v2016_v45  ;;  %v2034_v9 = vsub.f32 %v1827_v61, %v1974_v14 }
 0x197   :  { %v689_v56 = vmul.f32 %v2022_v31, %v2022_v31  ;;  %v2040_v8 = vsub.f32 %v1835_v1, %v1974_v14 }
 0x198   :  { %v747_v21 = vadd.f32 %v746_v26, %v684_v40  ;;  %v690_v58 = vmul.f32 %v2028_v48, %v2028_v48  ;;  %v2046_v26 = vsub.f32 %v1843_v5, %v1974_v14  ;;  %v691_v61 = vmul.f32 %v2034_v9, %v2034_v9 }
 0x199   :  { %v692_v1 = vmul.f32 %v2040_v8, %v2040_v8 }
 0x19a   :  { %v748_v3 = vadd.f32 %v747_v21, %v685_v33  ;;  %v2052_v21 = vsub.f32 %v1852_v10, %v1974_v14  ;;  %v693_v5 = vmul.f32 %v2046_v26, %v2046_v26 }
 0x19c   :  { %v749_v38 = vadd.f32 %v748_v3, %v686_v46  ;;  %v2058_v3 = vsub.f32 %v1862_v17, %v1974_v14  ;;  %v694_v10 = vmul.f32 %v2052_v21, %v2052_v21 }
 0x19e   :  { %v750_v49 = vadd.f32 %v749_v38, %v687_v50  ;;  %v2064_v38 = vsub.f32 %v1872_v24, %v1974_v14  ;;  %v695_v17 = vmul.f32 %v2058_v3, %v2058_v3 }
 0x1a0   :  { %v751_v19 = vadd.f32 %v750_v49, %v688_v53  ;;  %v2070_v49 = vsub.f32 %v1884_v32, %v1974_v14  ;;  %v696_v24 = vmul.f32 %v2064_v38, %v2064_v38 }
 0x1a2   :  { %v752_v40 = vadd.f32 %v751_v19, %v689_v56  ;;  %v2076_v19 = vsub.f32 %v1787_v39, %v1974_v14  ;;  %v697_v32 = vmul.f32 %v2070_v49, %v2070_v49 }
 0x1a4   :  { %v753_v33 = vadd.f32 %v752_v40, %v690_v58  ;;  %v2082_v40 = vsub.f32 %v1791_v41, %v1974_v14  ;;  %v698_v39 = vmul.f32 %v2076_v19, %v2076_v19 }
 0x1a6   :  { %v754_v46 = vadd.f32 %v753_v33, %v691_v61  ;;  %v2088_v33 = vsub.f32 %v1795_v44, %v1974_v14  ;;  %v699_v41 = vmul.f32 %v2082_v40, %v2082_v40 }
 0x1a8   :  { %v755_v50 = vadd.f32 %v754_v46, %v692_v1  ;;  %v2094_v46 = vsub.f32 %v1801_v47, %v1974_v14  ;;  %v700_v44 = vmul.f32 %v2088_v33, %v2088_v33 }
 0x1aa   :  { %v756_v53 = vadd.f32 %v755_v50, %v693_v5  ;;  %v2100_v50 = vsub.f32 %v1807_v51, %v1974_v14  ;;  %v701_v47 = vmul.f32 %v2094_v46, %v2094_v46 }
 0x1ac   :  { %v757_v56 = vadd.f32 %v756_v53, %v694_v10  ;;  %v2106_v53 = vsub.f32 %v1813_v54, %v1974_v14  ;;  %v702_v51 = vmul.f32 %v2100_v50, %v2100_v50 }
 0x1ae   :  { %v758_v58 = vadd.f32 %v757_v56, %v695_v17  ;;  %v2112_v56 = vsub.f32 %v1819_v57, %v1974_v14  ;;  %v703_v54 = vmul.f32 %v2106_v53, %v2106_v53 }
 0x1b0   :  { %v759_v61 = vadd.f32 %v758_v58, %v696_v24  ;;  %v2118_v58 = vsub.f32 %v1829_v62, %v1974_v14  ;;  %v704_v57 = vmul.f32 %v2112_v56, %v2112_v56 }
 0x1b2   :  { %v760_v1 = vadd.f32 %v759_v61, %v697_v32  ;;  %v2124_v61 = vsub.f32 %v1837_v2, %v1974_v14  ;;  %v705_v62 = vmul.f32 %v2118_v58, %v2118_v58 }
 0x1b4   :  { %v761_v5 = vadd.f32 %v760_v1, %v698_v39  ;;  %v2130_v1 = vsub.f32 %v1845_v6, %v1974_v14  ;;  %v706_v2 = vmul.f32 %v2124_v61, %v2124_v61 }
 0x1b6   :  { %v762_v10 = vadd.f32 %v761_v5, %v699_v41  ;;  %v2136_v5 = vsub.f32 %v1859_v15, %v1974_v14  ;;  %v707_v6 = vmul.f32 %v2130_v1, %v2130_v1 }
 0x1b8   :  { %v763_v17 = vadd.f32 %v762_v10, %v700_v44  ;;  %v2142_v10 = vsub.f32 %v1874_v25, %v1974_v14  ;;  %v708_v15 = vmul.f32 %v2136_v5, %v2136_v5 }
 0x1ba   :  { %v764_v24 = vadd.f32 %v763_v17, %v701_v47  ;;  %v2148_v17 = vsub.f32 %v1887_v34, %v1974_v14  ;;  %v709_v25 = vmul.f32 %v2142_v10, %v2142_v10 }
 0x1bc   :  { %v765_v32 = vadd.f32 %v764_v24, %v702_v51  ;;  %v2154_v24 = vsub.f32 %v1898_v12, %v1974_v14  ;;  %v710_v34 = vmul.f32 %v2148_v17, %v2148_v17 }
 0x1be   :  { %v766_v39 = vadd.f32 %v765_v32, %v703_v54  ;;  %v2969_v32 = vld [vmem:[#allocation22_spill] sm:$0xff]  ;;  %v711_v12 = vmul.f32 %v2154_v24, %v2154_v24 }
 0x1c0   :  { %v767_v41 = vadd.f32 %v766_v39, %v704_v57  ;;  %v2160_v57 = vsub.f32 %v2969_v32, %v1974_v14 }
 0x1c2   :  { %v768_v44 = vadd.f32 %v767_v41, %v705_v62  ;;  %v2166_v62 = vsub.f32 %v1920_v7, %v1974_v14 }
 0x1c4   :  { %v769_v47 = vadd.f32 %v768_v44, %v706_v2  ;;  %v2970_v2 = vld [vmem:[#allocation11_spill] sm:$0xff]  ;;  %v713_v7 = vmul.f32 %v2166_v62, %v2166_v62 }
 0x1c5   :  { %v2172_v44 = vsub.f32 %v2970_v2, %v1974_v14  ;;  %v2196_v2 = vsub.f32 %v1831_v63, %v1974_v14 }
 0x1c6   :  { %v770_v51 = vadd.f32 %v769_v47, %v707_v6  ;;  %v712_v6 = vmul.f32 %v2160_v57, %v2160_v57 }
 0x1c7   :  { %v714_v32 = vmul.f32 %v2172_v44, %v2172_v44  ;;  %v718_v63 = vmul.f32 %v2196_v2, %v2196_v2 }
 0x1c8   :  { %v771_v54 = vadd.f32 %v770_v51, %v708_v15  ;;  %v2971_v15 = vld [vmem:[#allocation12_spill] sm:$0xff] }
 0x1c9   :  { %v2178_v51 = vsub.f32 %v2971_v15, %v1974_v14 }
 0x1ca   :  { %v772_v39 = vadd.f32 %v771_v54, %v709_v25  ;;  %v2184_v54 = vsub.f32 %v1815_v55, %v1974_v14 }
 0x1cb   :  { %2972 = vst [vmem:[#allocation22_spill] sm:$0xff] %v2178_v51 }
 0x1cc   :  { %v773_v41 = vadd.f32 %v772_v39, %v710_v34  ;;  %2973 = vst [vmem:[#allocation11_spill] sm:$0xff] %v2184_v54  ;;  %v2190_v39 = vsub.f32 %v1823_v59, %v1974_v14  ;;  %v716_v55 = vmul.f32 %v2184_v54, %v2184_v54 }
 0x1ce   :  { %v774_v47 = vadd.f32 %v773_v41, %v711_v12  ;;  %v715_v12 = vmul.f32 %v2178_v51, %v2178_v51  ;;  %v717_v59 = vmul.f32 %v2190_v39, %v2190_v39 }
 0x1d0   :  { %v775_v25 = vadd.f32 %v774_v47, %v712_v6  ;;  %v2974_v47 = vld [vmem:[#allocation14_spill] sm:$0xff] }
 0x1d1   :  { %v2202_v15 = vsub.f32 %v2974_v47, %v1974_v14  ;;  %v2220_v47 = vsub.f32 %v1877_v27, %v1974_v14 }
 0x1d2   :  { %v776_v34 = vadd.f32 %v775_v25, %v713_v7  ;;  %v2976_v25 = vld [vmem:[#allocation15_spill] sm:$0xff] }
 0x1d3   :  { %2975 = vst [vmem:[#allocation12_spill] sm:$0xff] %v2202_v15  ;;  %v2208_v51 = vsub.f32 %v2976_v25, %v1974_v14  ;;  %v2226_v25 = vsub.f32 %v1890_v37, %v1974_v14  ;;  %v722_v27 = vmul.f32 %v2220_v47, %v2220_v47 }
 0x1d4   :  { %v777_v41 = vadd.f32 %v776_v34, %v714_v32  ;;  %v2978_v34 = vld [vmem:[#allocation16_spill] sm:$0xff] }
 0x1d5   :  { %2977 = vst [vmem:[#allocation14_spill] sm:$0xff] %v2208_v51  ;;  %v2214_v54 = vsub.f32 %v2978_v34, %v1974_v14  ;;  %v2979_v34 = vld [vmem:[#allocation20_spill] sm:$0xff]  ;;  %v723_v37 = vmul.f32 %v2226_v25, %v2226_v25 }
 0x1d6   :  { %v778_v6 = vadd.f32 %v777_v41, %v715_v12  ;;  %v719_v12 = vmul.f32 %v2202_v15, %v2202_v15  ;;  %v2232_v15 = vsub.f32 %v2979_v34, %v1974_v14  ;;  %v2250_v34 = vsub.f32 %v1932_v35, %v1974_v14 }
 0x1d8   :  { %v779_v7 = vadd.f32 %v778_v6, %v716_v55  ;;  %v720_v55 = vmul.f32 %v2208_v51, %v2208_v51 }
 0x1da   :  { %v780_v32 = vadd.f32 %v779_v7, %v717_v59  ;;  %v721_v59 = vmul.f32 %v2214_v54, %v2214_v54 }
 0x1dc   :  { %v781_v41 = vadd.f32 %v780_v32, %v718_v63  ;;  %v2980_v32 = vld [vmem:[#allocation23_spill] sm:$0xff] }
 0x1dd   :  { %v2238_v51 = vsub.f32 %v2980_v32, %v1974_v14  ;;  %v2256_v32 = vsub.f32 %v1941_v52, %v1974_v14  ;;  %v2270_v52 = vsub.f32 %v1833_v0, %v1974_v14 }
 0x1de   :  { %v782_v6 = vadd.f32 %v781_v41, %v719_v12  ;;  %v2244_v41 = vsub.f32 %v1923_v13, %v1974_v14 }
 0x1df   :  { %2981 = vst [vmem:[#allocation15_spill] sm:$0xff] %v2238_v51  ;;  %v731_v0 = vmul.f32 %v2270_v52, %v2270_v52 }
 0x1e0   :  { %v783_v7 = vadd.f32 %v782_v6, %v720_v55  ;;  %v724_v55 = vmul.f32 %v2232_v15, %v2232_v15  ;;  %v726_v13 = vmul.f32 %v2244_v41, %v2244_v41  ;;  %2984 = vst [vmem:[#allocation20_spill] sm:$0xff] %v2270_v52 }
 0x1e2   :  { %v784_v63 = vadd.f32 %v783_v7, %v721_v59  ;;  %v725_v59 = vmul.f32 %v2238_v51, %v2238_v51  ;;  %v728_v51 = vmul.f32 %v2256_v32, %v2256_v32 }
 0x1e4   :  { %v785_v12 = vadd.f32 %v784_v63, %v722_v27  ;;  %v727_v63 = vmul.f32 %v2250_v34, %v2250_v34 }
 0x1e6   :  { %v786_v6 = vadd.f32 %v785_v12, %v723_v37  ;;  %v2982_v12 = vld [vmem:[#allocation13_spill] sm:$0xff] }
 0x1e7   :  { %v2264_v35 = vsub.f32 %v2982_v12, %v1974_v14  ;;  %v2282_v12 = vsub.f32 %v1854_v11, %v1974_v14 }
 0x1e8   :  { %v787_v7 = vadd.f32 %v786_v6, %v724_v55  ;;  %v729_v6 = vmul.f32 %v1977_v16, %v1977_v16 }
 0x1e9   :  { %2983 = vst [vmem:[#allocation16_spill] sm:$0xff] %v2264_v35  ;;  %v733_v11 = vmul.f32 %v2282_v12, %v2282_v12 }
 0x1ea   :  { %v788_v27 = vadd.f32 %v787_v7, %v725_v59  ;;  %v2276_v7 = vsub.f32 %v1841_v4, %v1974_v14  ;;  %2986 = vst [vmem:[#allocation13_spill] sm:$0xff] %v2282_v12 }
 0x1ec   :  { %v789_v37 = vadd.f32 %v788_v27, %v726_v13  ;;  %2985 = vst [vmem:[#allocation23_spill] sm:$0xff] %v2276_v7  ;;  %v730_v13 = vmul.f32 %v2264_v35, %v2264_v35  ;;  %v732_v4 = vmul.f32 %v2276_v7, %v2276_v7 }
 0x1ee   :  { %v790_v55 = vadd.f32 %v789_v37, %v727_v63  ;;  %v2987_v37 = vld [vmem:[#allocation17_spill] sm:$0xff] }
 0x1ef   :  { %v2288_v16 = vsub.f32 %v2987_v37, %v1974_v14  ;;  %v2993_v37 = vld [vmem:[#allocation21_spill] sm:$0xff] }
 0x1f0   :  { %v791_v59 = vadd.f32 %v790_v55, %v728_v51  ;;  %v2989_v55 = vld [vmem:[#allocation18_spill] sm:$0xff]  ;;  %v2306_v7 = vsub.f32 %v2993_v37, %v1974_v14 }
 0x1f1   :  { %2988 = vst [vmem:[#allocation17_spill] sm:$0xff] %v2288_v16  ;;  %v2294_v35 = vsub.f32 %v2989_v55, %v1974_v14  ;;  %v2995_v55 = vld [vmem:[#allocation24_spill] sm:$0xff]  ;;  %v2999_v37 = vld [vmem:[#allocation26_spill] sm:$0xff] }
 0x1f2   :  { %v792_v27 = vadd.f32 %v791_v59, %v729_v6  ;;  %v2991_v59 = vld [vmem:[#allocation19_spill] sm:$0xff]  ;;  %2994 = vst [vmem:[#allocation21_spill] sm:$0xff] %v2306_v7  ;;  %v2312_v12 = vsub.f32 %v2995_v55, %v1974_v14  ;;  %v2330_v55 = vsub.f32 %v1944_v23, %v1974_v14 }
 0x1f3   :  { %2990 = vst [vmem:[#allocation18_spill] sm:$0xff] %v2294_v35  ;;  %v2300_v52 = vsub.f32 %v2991_v59, %v1974_v14  ;;  %v2997_v59 = vld [vmem:[#allocation25_spill] sm:$0xff] }
 0x1f4   :  { %v793_v63 = vadd.f32 %v792_v27, %v730_v13  ;;  %v734_v13 = vmul.f32 %v2288_v16, %v2288_v16  ;;  %2996 = vst [vmem:[#allocation24_spill] sm:$0xff] %v2312_v12  ;;  %v2318_v16 = vsub.f32 %v2997_v59, %v1974_v14  ;;  %v3002_v59 = vld [vmem:[#allocation27_spill] sm:$0xff]  ;;  %v741_v23 = vmul.f32 %v2330_v55, %v2330_v55 }
 0x1f5   :  { %2992 = vst [vmem:[#allocation19_spill] sm:$0xff] %v2300_v52 }
 0x1f6   :  { %v794_v51 = vadd.f32 %v793_v63, %v731_v0  ;;  %v735_v0 = vmul.f32 %v2294_v35, %v2294_v35  ;;  %2998 = vst [vmem:[#allocation25_spill] sm:$0xff] %v2318_v16  ;;  %v2324_v35 = vsub.f32 %v2999_v37, %v1974_v14  ;;  %v2342_v37 = vsub.f32 %v1957_v30, %v1974_v14 }
 0x1f7   :  { %3001 = vst [vmem:[#allocation29_spill] sm:$0xff] %v2330_v55  ;;  %v745_v30 = vmul.f32 %v1980_v22, %v1980_v22 }
 0x1f8   :  { %v795_v6 = vadd.f32 %v794_v51, %v732_v4  ;;  %v736_v4 = vmul.f32 %v2300_v52, %v2300_v52  ;;  %3000 = vst [vmem:[#allocation26_spill] sm:$0xff] %v2324_v35 }
 0x1f9   :  { %3004 = vst [vmem:[#allocation30_spill] sm:$0xff] %v2342_v37 }
 0x1fa   :  { %v796_v27 = vadd.f32 %v795_v6, %v733_v11  ;;  %v737_v11 = vmul.f32 %v2306_v7, %v2306_v7  ;;  %v2336_v7 = vsub.f32 %v3002_v59, %v1974_v14  ;;  %v743_v59 = vmul.f32 %v2342_v37, %v2342_v37 }
 0x1fc   :  { %v797_v63 = vadd.f32 %v796_v27, %v734_v13  ;;  %v738_v13 = vmul.f32 %v2312_v12, %v2312_v12  ;;  %3003 = vst [vmem:[#allocation27_spill] sm:$0xff] %v2336_v7 }
 0x1fe   :  { %v798_v51 = vadd.f32 %v797_v63, %v735_v0  ;;  %v739_v0 = vmul.f32 %v2318_v16, %v2318_v16 }
 0x200   :  { %v799_v6 = vadd.f32 %v798_v51, %v736_v4  ;;  %v740_v4 = vmul.f32 %v2324_v35, %v2324_v35 }
 0x202   :  { %v800_v27 = vadd.f32 %v799_v6, %v737_v11  ;;  %v680_v6 = vsub.f32 %v1964_v60, %v1974_v14 }
 0x204   :  { %v801_v63 = vadd.f32 %v800_v27, %v738_v13  ;;  %v742_v13 = vmul.f32 %v2336_v7, %v2336_v7 }
 0x206   :  { %v802_v51 = vadd.f32 %v801_v63, %v739_v0  ;;  %v744_v0 = vmul.f32 %v680_v6, %v680_v6 }
 0x208   :  { %v803_v11 = vadd.f32 %v802_v51, %v740_v4 }
 0x20a   :  { %v804_v27 = vadd.f32 %v803_v11, %v741_v23 }
 0x20c   :  { %v805_v35 = vadd.f32 %v804_v27, %v742_v13 }
 0x20e   :  { %v806_v63 = vadd.f32 %v805_v35, %v743_v59 }
 0x210   :  { %v807_v16 = vadd.f32 %v806_v63, %v744_v0 }
 0x212   :  { %v808_v12 = vadd.f32 %v807_v16, %v745_v30  ;;  %v2358_v16 = vld [vmem:[%s2909_s2] ss:$0 sm:$0xff]  ;;  %s1747_s2 = smov [#allocation7]  }
 0x214   :  { %v809_v55 = vrot.slane %v808_v12, 4 }
 0x216   :  { %v810_v4 = vadd.f32 %v809_v55, %v808_v12 }
 0x218   :  { %v811_v51 = vrot.slane %v810_v4, 2 }
 0x21a   :  { %v812_v52 = vadd.f32 %v811_v51, %v810_v4 }
 0x21c   :  { %v813_v60 = vrot.slane %v812_v52, 1 }
 0x21e   :  { %v814_v14 = vadd.f32 %v813_v60, %v812_v52 }
 0x220   :  { %v815_v7 = vmul.f32 %v814_v14, %v1971_v18  ;;  %v2365_v18 = vld [vmem:[%s2910_s3] ss:$0 sm:$0xff]  ;;  %s1221_s3 = sshll.u32 %s1747_s2, 4  ;;  %s1222_s3 = int_to_ptr.vmem [resolvable:$true] %s1221_s3 }
 0x221   :  { %3005 = vst [vmem:[#allocation31_spill] sm:$0xff] %v2365_v18 }
 0x222   :  { %v816_v23 = vadd.f32 1e-05, %v815_v7 }
 0x224   :  { %1662 = vrsqrt.f32 %v816_v23  ;;  %vm823_vm2 = vweird.f32 %v816_v23 }
 0x22a   :  { %v1663_v11 = vpop.eup %1662 }
 0x22b   :  { %v818_v37 = vmul.f32 %v1663_v11, %v816_v23  ;;  %vm824_vm1 = vweird.f32 %v1663_v11 }
 0x22c   :  { %vm825_vm3 = vmor %vm823_vm2, %vm824_vm1 }
 0x22d   :  { %v819_v13 = vmul.f32 %v1663_v11, %v818_v37 }
 0x22f   :  { %v820_v27 = vmul.f32 0.5, %v819_v13 }
 0x231   :  { %v821_v35 = vsub.f32 1.5, %v820_v27 }
 0x233   :  { %v822_v59 = vmul.f32 %v1663_v11, %v821_v35  ;;  %v3015_v35 = vld [vmem:[#allocation12_spill] sm:$0xff] }
 0x235   :  { %v2360_v12 = vsel %vm825_vm3, %v1663_v11, %v822_v59  ;;  %v3013_v11 = vld [vmem:[#allocation22_spill] sm:$0xff] }
 0x236   :  { %v889_v52 = vmul.f32 %v2360_v12, %v680_v6  ;;  %v890_v7 = vmul.f32 %v2360_v12, %v1980_v22  ;;  %v2372_v55 = vmul.f32 %v2360_v12, %v1984_v28  ;;  %v2376_v37 = vmul.f32 %v2360_v12, %v1988_v29 }
 0x237   :  { %v2380_v0 = vmul.f32 %v2360_v12, %v1992_v20  ;;  %v2384_v63 = vmul.f32 %v2360_v12, %v2000_v43  ;;  %v2388_v6 = vmul.f32 %v2360_v12, %v2004_v36  ;;  %v2392_v22 = vmul.f32 %v2360_v12, %v2010_v42 }
 0x238   :  { %v956_v28 = vmul.f32 %v2358_v16, %v889_v52  ;;  %v957_v29 = vmul.f32 %v2358_v16, %v890_v7  ;;  %v2398_v20 = vmul.f32 %v2360_v12, %v2016_v45  ;;  %v2402_v43 = vmul.f32 %v2360_v12, %v2022_v31  ;;  %v3016_v52 = vld [vmem:[#allocation14_spill] sm:$0xff] }
 0x239   :  { %v2406_v36 = vmul.f32 %v2360_v12, %v2028_v48  ;;  %v2410_v42 = vmul.f32 %v2360_v12, %v2034_v9  ;;  %v2414_v30 = vmul.f32 %v2360_v12, %v2040_v8  ;;  %v2418_v45 = vmul.f32 %v2360_v12, %v2046_v26 }
 0x23a   :  { %v1023_v4 = vadd.f32 %v2365_v18, %v956_v28  ;;  %v1024_v31 = vadd.f32 %v2365_v18, %v957_v29  ;;  %v2424_v48 = vmul.f32 %v2360_v12, %v2052_v21  ;;  %v2428_v9 = vmul.f32 %v2360_v12, %v2058_v3  ;;  %v3017_v29 = vld [vmem:[#allocation15_spill] sm:$0xff] }
 0x23b   :  { %v2432_v8 = vmul.f32 %v2360_v12, %v2064_v38  ;;  %v2436_v26 = vmul.f32 %v2360_v12, %v2070_v49  ;;  %v2440_v51 = vmul.f32 %v2360_v12, %v2076_v19  ;;  %v2444_v21 = vmul.f32 %v2360_v12, %v2082_v40  ;;  %v3025_v18 = vld [vmem:[#allocation19_spill] sm:$0xff] }
 0x23c   :  { %v1087_v60 = vmax.f32 %v1023_v4, 0.0  ;;  %v1088_v14 = vmax.f32 %v1024_v31, 0.0  ;;  %v2448_v3 = vmul.f32 %v2360_v12, %v2088_v33  ;;  %v2452_v38 = vmul.f32 %v2360_v12, %v2094_v46 }
 0x23d   :  { %v2456_v49 = vmul.f32 %v2360_v12, %v2100_v50  ;;  %v2460_v19 = vmul.f32 %v2360_v12, %v2106_v53  ;;  %v2464_v40 = vmul.f32 %v2360_v12, %v2112_v56  ;;  %v2468_v33 = vmul.f32 %v2360_v12, %v2118_v58 }
 0x23e   :  { %v1595_v23 = vpack.c.bf16 %v1088_v14, %v1087_v60  ;;  %v2472_v46 = vmul.f32 %v2360_v12, %v2124_v61  ;;  %v2476_v50 = vmul.f32 %v2360_v12, %v2130_v1  ;;  %v2480_v53 = vmul.f32 %v2360_v12, %v2136_v5  ;;  %v3018_v60 = vld [vmem:[#allocation28_spill] sm:$0xff] }
 0x23f   :  { %v2484_v56 = vmul.f32 %v2360_v12, %v2142_v10  ;;  %v2488_v58 = vmul.f32 %v2360_v12, %v2148_v17  ;;  %v2492_v61 = vmul.f32 %v2360_v12, %v2154_v24  ;;  %v2496_v1 = vmul.f32 %v2360_v12, %v2160_v57  ;;  %v3014_v17 = vld [vmem:[#allocation11_spill] sm:$0xff]  ;;  %v3019_v14 = vld [vmem:[#allocation16_spill] sm:$0xff] }
 0x240   :  { %3006 = vst [vmem:[#allocation32_spill] sm:$0xff] %v2472_v46  ;;  %v858_v5 = vmul.f32 %v2360_v12, %v2166_v62  ;;  %v859_v10 = vmul.f32 %v2360_v12, %v2172_v44  ;;  %v860_v13 = vmul.f32 %v2360_v12, %v3013_v11  ;;  %v861_v27 = vmul.f32 %v2360_v12, %v3014_v17  ;;  %v3021_v11 = vld [vmem:[#allocation23_spill] sm:$0xff]  ;;  %v3032_v46 = vld [vmem:[#allocation30_spill] sm:$0xff] }
 0x241   :  { %3007 = vst [vmem:[#allocation33_spill] sm:$0xff] %v2476_v50  ;;  %v862_v24 = vmul.f32 %v2360_v12, %v2190_v39  ;;  %v863_v57 = vmul.f32 %v2360_v12, %v2196_v2  ;;  %v864_v59 = vmul.f32 %v2360_v12, %v3015_v35  ;;  %v865_v62 = vmul.f32 %v2360_v12, %v3016_v52  ;;  %v3022_v35 = vld [vmem:[#allocation13_spill] sm:$0xff]  ;;  %v3031_v50 = vld [vmem:[#allocation27_spill] sm:$0xff] }
 0x242   :  { %3008 = vst [vmem:[#allocation34_spill] sm:$0xff] %v2480_v53  ;;  %v866_v44 = vmul.f32 %v2360_v12, %v2214_v54  ;;  %v867_v7 = vmul.f32 %v2360_v12, %v2220_v47  ;;  %v868_v28 = vmul.f32 %v2360_v12, %v2226_v25  ;;  %v869_v39 = vmul.f32 %v2360_v12, %v2232_v15  ;;  %v3023_v52 = vld [vmem:[#allocation17_spill] sm:$0xff] }
 0x243   :  { %3009 = vst [vmem:[#allocation35_spill] sm:$0xff] %v2484_v56  ;;  %v870_v2 = vmul.f32 %v2360_v12, %v3017_v29  ;;  %v871_v4 = vmul.f32 %v2360_v12, %v2244_v41  ;;  %v872_v31 = vmul.f32 %v2360_v12, %v2250_v34  ;;  %v873_v54 = vmul.f32 %v2360_v12, %v2256_v32  ;;  %v3024_v29 = vld [vmem:[#allocation18_spill] sm:$0xff]  ;;  %v3030_v53 = vld [vmem:[#allocation29_spill] sm:$0xff] }
 0x244   :  { %3010 = vst [vmem:[#allocation36_spill] sm:$0xff] %v2488_v58  ;;  %v874_v47 = vmul.f32 %v2360_v12, %v3018_v60  ;;  %v875_v25 = vmul.f32 %v2360_v12, %v3019_v14  ;;  %v877_v17 = vmul.f32 %v2360_v12, %v3021_v11  ;;  %v878_v41 = vmul.f32 %v2360_v12, %v3022_v35  ;;  %v3028_v58 = vld [vmem:[#allocation25_spill] sm:$0xff]  ;;  %v3029_v56 = vld [vmem:[#allocation26_spill] sm:$0xff] }
 0x245   :  { %3011 = vst [vmem:[#allocation37_spill] sm:$0xff] %v2492_v61  ;;  %v879_v34 = vmul.f32 %v2360_v12, %v3023_v52  ;;  %v880_v32 = vmul.f32 %v2360_v12, %v3024_v29  ;;  %v881_v60 = vmul.f32 %v2360_v12, %v3025_v18  ;;  %v3027_v61 = vld [vmem:[#allocation24_spill] sm:$0xff]  ;;  %v884_v11 = vmul.f32 %v2360_v12, %v3028_v58 }
 0x246   :  { %3012 = vst [vmem:[#allocation38_spill] sm:$0xff] %v2496_v1  ;;  %v3026_v1 = vld [vmem:[#allocation21_spill] sm:$0xff]  ;;  %v885_v35 = vmul.f32 %v2360_v12, %v3029_v56  ;;  %v886_v52 = vmul.f32 %v2360_v12, %v3030_v53  ;;  %v887_v29 = vmul.f32 %v2360_v12, %v3031_v50  ;;  %v888_v18 = vmul.f32 %v2360_v12, %v3032_v46 }
 0x247   :  { %1627 = vst [vmem:[#allocation7 + $0xf8] sm:$0xff] %v1595_v23   ;;  %v3020_v23 = vld [vmem:[#allocation20_spill] sm:$0xff]  ;;  %v882_v14 = vmul.f32 %v2360_v12, %v3026_v1  ;;  %v894_v1 = vmul.f32 %v2358_v16, %v2372_v55  ;;  %v896_v58 = vmul.f32 %v2358_v16, %v2380_v0  ;;  %v897_v56 = vmul.f32 %v2358_v16, %v2384_v63 }
 0x248   :  { %v876_v15 = vmul.f32 %v2360_v12, %v3020_v23  ;;  %v883_v23 = vmul.f32 %v2360_v12, %v3027_v61  ;;  %v895_v61 = vmul.f32 %v2358_v16, %v2376_v37  ;;  %v898_v53 = vmul.f32 %v2358_v16, %v2388_v6  ;;  %v3033_v46 = vld [vmem:[#allocation32_spill] sm:$0xff] }
 0x249   :  { %v899_v50 = vmul.f32 %v2358_v16, %v2392_v22  ;;  %v900_v12 = vmul.f32 %v2358_v16, %v2398_v20  ;;  %v901_v55 = vmul.f32 %v2358_v16, %v2402_v43  ;;  %v902_v37 = vmul.f32 %v2358_v16, %v2406_v36 }
 0x24a   :  { %v903_v0 = vmul.f32 %v2358_v16, %v2410_v42  ;;  %v904_v63 = vmul.f32 %v2358_v16, %v2414_v30  ;;  %v905_v6 = vmul.f32 %v2358_v16, %v2418_v45  ;;  %v906_v22 = vmul.f32 %v2358_v16, %v2424_v48 }
 0x24b   :  { %v907_v20 = vmul.f32 %v2358_v16, %v2428_v9  ;;  %v908_v43 = vmul.f32 %v2358_v16, %v2432_v8  ;;  %v909_v36 = vmul.f32 %v2358_v16, %v2436_v26  ;;  %v910_v42 = vmul.f32 %v2358_v16, %v2440_v51 }
 0x24c   :  { %v911_v30 = vmul.f32 %v2358_v16, %v2444_v21  ;;  %v912_v45 = vmul.f32 %v2358_v16, %v2448_v3  ;;  %v913_v48 = vmul.f32 %v2358_v16, %v2452_v38  ;;  %v914_v9 = vmul.f32 %v2358_v16, %v2456_v49  ;;  %v3034_v3 = vld [vmem:[#allocation33_spill] sm:$0xff]  ;;  %v3035_v49 = vld [vmem:[#allocation34_spill] sm:$0xff] }
 0x24d   :  { %v915_v8 = vmul.f32 %v2358_v16, %v2460_v19  ;;  %v916_v26 = vmul.f32 %v2358_v16, %v2464_v40  ;;  %v917_v51 = vmul.f32 %v2358_v16, %v2468_v33  ;;  %v918_v21 = vmul.f32 %v2358_v16, %v3033_v46  ;;  %v3036_v40 = vld [vmem:[#allocation35_spill] sm:$0xff]  ;;  %v3037_v46 = vld [vmem:[#allocation36_spill] sm:$0xff] }
 0x24e   :  { %v919_v38 = vmul.f32 %v2358_v16, %v3034_v3  ;;  %v920_v19 = vmul.f32 %v2358_v16, %v3035_v49  ;;  %v921_v33 = vmul.f32 %v2358_v16, %v3036_v40  ;;  %v922_v3 = vmul.f32 %v2358_v16, %v3037_v46  ;;  %v3038_v49 = vld [vmem:[#allocation37_spill] sm:$0xff]  ;;  %v3039_v46 = vld [vmem:[#allocation38_spill] sm:$0xff] }
 0x24f   :  { %v923_v40 = vmul.f32 %v2358_v16, %v3038_v49  ;;  %v924_v49 = vmul.f32 %v2358_v16, %v3039_v46  ;;  %v925_v46 = vmul.f32 %v2358_v16, %v858_v5  ;;  %v926_v5 = vmul.f32 %v2358_v16, %v859_v10 }
 0x250   :  { %v927_v10 = vmul.f32 %v2358_v16, %v860_v13  ;;  %v928_v13 = vmul.f32 %v2358_v16, %v861_v27  ;;  %v929_v27 = vmul.f32 %v2358_v16, %v862_v24  ;;  %v930_v24 = vmul.f32 %v2358_v16, %v863_v57 }
 0x251   :  { %v931_v57 = vmul.f32 %v2358_v16, %v864_v59  ;;  %v932_v59 = vmul.f32 %v2358_v16, %v865_v62  ;;  %v933_v62 = vmul.f32 %v2358_v16, %v866_v44  ;;  %v934_v44 = vmul.f32 %v2358_v16, %v867_v7 }
 0x252   :  { %v935_v7 = vmul.f32 %v2358_v16, %v868_v28  ;;  %v936_v28 = vmul.f32 %v2358_v16, %v869_v39  ;;  %v937_v39 = vmul.f32 %v2358_v16, %v870_v2  ;;  %v938_v2 = vmul.f32 %v2358_v16, %v871_v4 }
 0x253   :  { %v939_v4 = vmul.f32 %v2358_v16, %v872_v31  ;;  %v940_v31 = vmul.f32 %v2358_v16, %v873_v54  ;;  %v941_v54 = vmul.f32 %v2358_v16, %v874_v47  ;;  %v942_v47 = vmul.f32 %v2358_v16, %v875_v25 }
 0x254   :  { %v943_v25 = vmul.f32 %v2358_v16, %v876_v15  ;;  %v944_v15 = vmul.f32 %v2358_v16, %v877_v17  ;;  %v945_v17 = vmul.f32 %v2358_v16, %v878_v41  ;;  %v946_v41 = vmul.f32 %v2358_v16, %v879_v34 }
 0x255   :  { %v947_v34 = vmul.f32 %v2358_v16, %v880_v32  ;;  %v948_v32 = vmul.f32 %v2358_v16, %v881_v60  ;;  %v949_v60 = vmul.f32 %v2358_v16, %v882_v14  ;;  %v950_v14 = vmul.f32 %v2358_v16, %v883_v23 }
 0x256   :  { %v951_v23 = vmul.f32 %v2358_v16, %v884_v11  ;;  %v952_v11 = vmul.f32 %v2358_v16, %v885_v35  ;;  %v953_v35 = vmul.f32 %v2358_v16, %v886_v52  ;;  %v954_v52 = vmul.f32 %v2358_v16, %v887_v29 }
 0x257   :  { %v955_v29 = vmul.f32 %v2358_v16, %v888_v18  ;;  %v3040_v16 = vld [vmem:[#allocation31_spill] sm:$0xff] }
 0x258   :  { %v2654_v18 = vadd.f32 %v3040_v16, %v894_v1  ;;  %v2657_v1 = vadd.f32 %v3040_v16, %v895_v61  ;;  %v2663_v61 = vadd.f32 %v3040_v16, %v897_v56  ;;  %v2675_v56 = vadd.f32 %v3040_v16, %v901_v55 }
 0x259   :  { %v2696_v55 = vadd.f32 %v3040_v16, %v908_v43  ;;  %v2717_v43 = vadd.f32 %v3040_v16, %v915_v8  ;;  %v2738_v8 = vadd.f32 %v3040_v16, %v922_v3  ;;  %v2759_v3 = vadd.f32 %v3040_v16, %v929_v27 }
 0x25a   :  { %3041 = vst [vmem:[#allocation22_spill] sm:$0xff] %v2654_v18  ;;  %v2660_v18 = vadd.f32 %v3040_v16, %v896_v58  ;;  %v2669_v58 = vadd.f32 %v3040_v16, %v899_v50  ;;  %v2687_v50 = vadd.f32 %v3040_v16, %v905_v6  ;;  %v2708_v6 = vadd.f32 %v3040_v16, %v912_v45 }
 0x25b   :  { %3042 = vst [vmem:[#allocation11_spill] sm:$0xff] %v2657_v1  ;;  %v2666_v1 = vadd.f32 %v3040_v16, %v898_v53  ;;  %v2681_v53 = vadd.f32 %v3040_v16, %v903_v0  ;;  %v2702_v0 = vadd.f32 %v3040_v16, %v910_v42  ;;  %v2723_v42 = vadd.f32 %v3040_v16, %v917_v51 }
 0x25c   :  { %3043 = vst [vmem:[#allocation12_spill] sm:$0xff] %v2660_v18  ;;  %v2672_v18 = vadd.f32 %v3040_v16, %v900_v12  ;;  %v2693_v12 = vadd.f32 %v3040_v16, %v907_v20  ;;  %v2714_v20 = vadd.f32 %v3040_v16, %v914_v9  ;;  %v2729_v45 = vadd.f32 %v3040_v16, %v919_v38 }
 0x25d   :  { %3044 = vst [vmem:[#allocation14_spill] sm:$0xff] %v2663_v61  ;;  %v2678_v61 = vadd.f32 %v3040_v16, %v902_v37  ;;  %v2699_v37 = vadd.f32 %v3040_v16, %v909_v36  ;;  %v2720_v36 = vadd.f32 %v3040_v16, %v916_v26  ;;  %v2735_v9 = vadd.f32 %v3040_v16, %v921_v33 }
 0x25e   :  { %3045 = vst [vmem:[#allocation15_spill] sm:$0xff] %v2666_v1  ;;  %v2684_v1 = vadd.f32 %v3040_v16, %v904_v63  ;;  %v2705_v63 = vadd.f32 %v3040_v16, %v911_v30  ;;  %v2726_v30 = vadd.f32 %v3040_v16, %v918_v21  ;;  %v2741_v26 = vadd.f32 %v3040_v16, %v923_v40 }
 0x25f   :  { %3046 = vst [vmem:[#allocation28_spill] sm:$0xff] %v2669_v58  ;;  %v2690_v58 = vadd.f32 %v3040_v16, %v906_v22  ;;  %v2711_v22 = vadd.f32 %v3040_v16, %v913_v48  ;;  %v2732_v48 = vadd.f32 %v3040_v16, %v920_v19  ;;  %v2744_v51 = vadd.f32 %v3040_v16, %v924_v49 }
 0x260   :  { %v2747_v21 = vadd.f32 %v3040_v16, %v925_v46  ;;  %v2750_v38 = vadd.f32 %v3040_v16, %v926_v5  ;;  %v2753_v19 = vadd.f32 %v3040_v16, %v927_v10  ;;  %v2756_v33 = vadd.f32 %v3040_v16, %v928_v13 }
 0x261   :  { %v2762_v40 = vadd.f32 %v3040_v16, %v930_v24  ;;  %v2765_v49 = vadd.f32 %v3040_v16, %v931_v57  ;;  %v2768_v46 = vadd.f32 %v3040_v16, %v932_v59  ;;  %v2771_v5 = vadd.f32 %v3040_v16, %v933_v62 }
 0x262   :  { %v2774_v10 = vadd.f32 %v3040_v16, %v934_v44  ;;  %v2777_v13 = vadd.f32 %v3040_v16, %v935_v7  ;;  %v2780_v27 = vadd.f32 %v3040_v16, %v936_v28  ;;  %v2783_v24 = vadd.f32 %v3040_v16, %v937_v39 }
 0x263   :  { %v2786_v57 = vadd.f32 %v3040_v16, %v938_v2  ;;  %v2789_v59 = vadd.f32 %v3040_v16, %v939_v4  ;;  %v2792_v62 = vadd.f32 %v3040_v16, %v940_v31  ;;  %v2795_v44 = vadd.f32 %v3040_v16, %v941_v54 }
 0x264   :  { %v2798_v7 = vadd.f32 %v3040_v16, %v942_v47  ;;  %v2801_v28 = vadd.f32 %v3040_v16, %v943_v25  ;;  %v2804_v39 = vadd.f32 %v3040_v16, %v944_v15  ;;  %v2807_v2 = vadd.f32 %v3040_v16, %v945_v17 }
 0x265   :  { %v2810_v4 = vadd.f32 %v3040_v16, %v946_v41  ;;  %v2813_v31 = vadd.f32 %v3040_v16, %v947_v34  ;;  %v2816_v54 = vadd.f32 %v3040_v16, %v948_v32  ;;  %v2819_v47 = vadd.f32 %v3040_v16, %v949_v60  ;;  %v3058_v60 = vld [vmem:[#allocation22_spill] sm:$0xff] }
 0x266   :  { %3047 = vst [vmem:[#allocation16_spill] sm:$0xff] %v2807_v2  ;;  %v2822_v25 = vadd.f32 %v3040_v16, %v950_v14  ;;  %v2825_v15 = vadd.f32 %v3040_v16, %v951_v23  ;;  %v2828_v17 = vadd.f32 %v3040_v16, %v952_v11  ;;  %v2831_v41 = vadd.f32 %v3040_v16, %v953_v35  ;;  %v3061_v23 = vld [vmem:[#allocation14_spill] sm:$0xff] }
 0x267   :  { %3048 = vst [vmem:[#allocation20_spill] sm:$0xff] %v2810_v4  ;;  %v2834_v34 = vadd.f32 %v3040_v16, %v954_v52  ;;  %v2837_v32 = vadd.f32 %v3040_v16, %v955_v29  ;;  %v3062_v4 = vld [vmem:[#allocation15_spill] sm:$0xff]  ;;  %v1031_v35 = vmax.f32 %v2672_v18, 0.0  ;;  %v1032_v52 = vmax.f32 %v2675_v56, 0.0 }
 0x268   :  { %3049 = vst [vmem:[#allocation23_spill] sm:$0xff] %v2813_v31  ;;  %v1029_v11 = vmax.f32 %v3062_v4, 0.0  ;;  %v1034_v29 = vmax.f32 %v2681_v53, 0.0  ;;  %v1035_v16 = vmax.f32 %v2684_v1, 0.0  ;;  %v1039_v4 = vmax.f32 %v2696_v55, 0.0 }
 0x269   :  { %3050 = vst [vmem:[#allocation13_spill] sm:$0xff] %v2816_v54  ;;  %v3059_v54 = vld [vmem:[#allocation11_spill] sm:$0xff]  ;;  %v1041_v18 = vmax.f32 %v2702_v0, 0.0  ;;  %v1042_v56 = vmax.f32 %v2705_v63, 0.0  ;;  %v1044_v53 = vmax.f32 %v2711_v22, 0.0  ;;  %v1045_v1 = vmax.f32 %v2714_v20, 0.0 }
 0x26a   :  { %3051 = vst [vmem:[#allocation17_spill] sm:$0xff] %v2819_v47  ;;  %v1025_v47 = vmax.f32 %v3058_v60, 0.0  ;;  %v1026_v14 = vmax.f32 %v3059_v54, 0.0  ;;  %v1036_v54 = vmax.f32 %v2687_v50, 0.0  ;;  %v1038_v60 = vmax.f32 %v2693_v12, 0.0 }
 0x26b   :  { %3052 = vst [vmem:[#allocation18_spill] sm:$0xff] %v2822_v25  ;;  %v3060_v25 = vld [vmem:[#allocation12_spill] sm:$0xff]  ;;  %v1046_v50 = vmax.f32 %v2717_v43, 0.0  ;;  %v1048_v12 = vmax.f32 %v2723_v42, 0.0  ;;  %v1049_v55 = vmax.f32 %v2726_v30, 0.0  ;;  %v1051_v0 = vmax.f32 %v2732_v48, 0.0 }
 0x26c   :  { %3053 = vst [vmem:[#allocation19_spill] sm:$0xff] %v2825_v15  ;;  %v1027_v31 = vmax.f32 %v3060_v25, 0.0  ;;  %v1028_v15 = vmax.f32 %v3061_v23, 0.0  ;;  %v1037_v25 = vmax.f32 %v2690_v58, 0.0  ;;  %v1047_v58 = vmax.f32 %v2720_v36, 0.0 }
 0x26d   :  { %3054 = vst [vmem:[#allocation21_spill] sm:$0xff] %v2828_v17  ;;  %v3063_v17 = vld [vmem:[#allocation28_spill] sm:$0xff]  ;;  %v1052_v63 = vmax.f32 %v2735_v9, 0.0  ;;  %v1054_v22 = vmax.f32 %v2741_v26, 0.0  ;;  %v1055_v20 = vmax.f32 %v2744_v51, 0.0  ;;  %v1056_v43 = vmax.f32 %v2747_v21, 0.0 }
 0x26e   :  { %3055 = vst [vmem:[#allocation24_spill] sm:$0xff] %v2831_v41  ;;  %v1030_v2 = vmax.f32 %v3063_v17, 0.0  ;;  %v1040_v17 = vmax.f32 %v2699_v37, 0.0  ;;  %v1050_v37 = vmax.f32 %v2729_v45, 0.0  ;;  %v1057_v36 = vmax.f32 %v2750_v38, 0.0  ;;  %v3064_v23 = vld [vmem:[#allocation16_spill] sm:$0xff] }
 0x26f   :  { %3056 = vst [vmem:[#allocation25_spill] sm:$0xff] %v2834_v34  ;;  %v1033_v34 = vmax.f32 %v2678_v61, 0.0  ;;  %v1043_v61 = vmax.f32 %v2708_v6, 0.0  ;;  %v1053_v6 = vmax.f32 %v2738_v8, 0.0  ;;  %v1058_v42 = vmax.f32 %v2753_v19, 0.0  ;;  %v3066_v41 = vld [vmem:[#allocation23_spill] sm:$0xff] }
 0x270   :  { %3057 = vst [vmem:[#allocation26_spill] sm:$0xff] %v2837_v32  ;;  %v1059_v30 = vmax.f32 %v2756_v33, 0.0  ;;  %v1060_v45 = vmax.f32 %v2759_v3, 0.0  ;;  %v1061_v48 = vmax.f32 %v2762_v40, 0.0  ;;  %v1062_v9 = vmax.f32 %v2765_v49, 0.0  ;;  %v3065_v32 = vld [vmem:[#allocation20_spill] sm:$0xff] }
 0x271   :  { %v1063_v8 = vmax.f32 %v2768_v46, 0.0  ;;  %v1064_v26 = vmax.f32 %v2771_v5, 0.0  ;;  %v1065_v51 = vmax.f32 %v2774_v10, 0.0  ;;  %v1066_v21 = vmax.f32 %v2777_v13, 0.0 }
 0x272   :  { %v1067_v38 = vmax.f32 %v2780_v27, 0.0  ;;  %v1068_v19 = vmax.f32 %v2783_v24, 0.0  ;;  %v1069_v33 = vmax.f32 %v2786_v57, 0.0  ;;  %v1070_v3 = vmax.f32 %v2789_v59, 0.0  ;;  %v3067_v57 = vld [vmem:[#allocation13_spill] sm:$0xff] }
 0x273   :  { %v1071_v40 = vmax.f32 %v2792_v62, 0.0  ;;  %v1072_v49 = vmax.f32 %v2795_v44, 0.0  ;;  %v1073_v46 = vmax.f32 %v2798_v7, 0.0  ;;  %v1074_v5 = vmax.f32 %v2801_v28, 0.0  ;;  %v3068_v62 = vld [vmem:[#allocation17_spill] sm:$0xff]  ;;  %v3069_v7 = vld [vmem:[#allocation18_spill] sm:$0xff] }
 0x274   :  { %v1075_v10 = vmax.f32 %v2804_v39, 0.0  ;;  %v1076_v13 = vmax.f32 %v3064_v23, 0.0  ;;  %v1077_v27 = vmax.f32 %v3065_v32, 0.0  ;;  %v1078_v24 = vmax.f32 %v3066_v41, 0.0  ;;  %v3070_v39 = vld [vmem:[#allocation19_spill] sm:$0xff]  ;;  %v3071_v32 = vld [vmem:[#allocation21_spill] sm:$0xff] }
 0x275   :  { %v1079_v59 = vmax.f32 %v3067_v57, 0.0  ;;  %v1080_v44 = vmax.f32 %v3068_v62, 0.0  ;;  %v1081_v28 = vmax.f32 %v3069_v7, 0.0  ;;  %v1082_v23 = vmax.f32 %v3070_v39, 0.0  ;;  %v3072_v57 = vld [vmem:[#allocation24_spill] sm:$0xff] }
 0x276   :  { %v1083_v41 = vmax.f32 %v3071_v32, 0.0  ;;  %v1084_v62 = vmax.f32 %v3072_v57, 0.0  ;;  %v3073_v7 = vld [vmem:[#allocation25_spill] sm:$0xff] }
 0x277   :  { %v1085_v39 = vmax.f32 %v3073_v7, 0.0  ;;  %v3074_v32 = vld [vmem:[#allocation26_spill] sm:$0xff]  ;;  %v1440_v7 = vpack.c.bf16 %v1026_v14, %v1025_v47  ;;  %v1450_v14 = vpack.c.bf16 %v1030_v2, %v1029_v11  ;;  %v1455_v47 = vpack.c.bf16 %v1032_v52, %v1031_v35 }
 0x278   :  { %v1086_v57 = vmax.f32 %v3074_v32, 0.0  ;;  %v1445_v32 = vpack.c.bf16 %v1028_v15, %v1027_v31  ;;  %v1460_v15 = vpack.c.bf16 %v1034_v29, %v1033_v34  ;;  %v1465_v31 = vpack.c.bf16 %v1036_v54, %v1035_v16 }
 0x279   :  { %v1470_v2 = vpack.c.bf16 %v1038_v60, %v1037_v25  ;;  %1441 = vst [vmem:[#allocation7] sm:$0xff] %v1440_v7   ;;  %v1475_v11 = vpack.c.bf16 %v1040_v17, %v1039_v4  ;;  %v1480_v35 = vpack.c.bf16 %v1042_v56, %v1041_v18  ;;  %v1485_v52 = vpack.c.bf16 %v1044_v53, %v1043_v61 }
 0x27a   :  { %v1490_v29 = vpack.c.bf16 %v1046_v50, %v1045_v1  ;;  %1597 = vst [vmem:[#allocation7 + $0x8] sm:$0xff] %v1445_v32   ;;  %v1495_v34 = vpack.c.bf16 %v1048_v12, %v1047_v58  ;;  %v1500_v16 = vpack.c.bf16 %v1050_v37, %v1049_v55  ;;  %v1505_v54 = vpack.c.bf16 %v1052_v63, %v1051_v0 }
 0x27b   :  { %v1510_v25 = vpack.c.bf16 %v1054_v22, %v1053_v6  ;;  %1598 = vst [vmem:[#allocation7 + $0x10] sm:$0xff] %v1450_v14   ;;  %v1515_v60 = vpack.c.bf16 %v1056_v43, %v1055_v20  ;;  %v1520_v7 = vpack.c.bf16 %v1058_v42, %v1057_v36  ;;  %v1525_v4 = vpack.c.bf16 %v1060_v45, %v1059_v30 }
 0x27c   :  { %v1530_v17 = vpack.c.bf16 %v1062_v9, %v1061_v48  ;;  %1599 = vst [vmem:[#allocation7 + $0x18] sm:$0xff] %v1455_v47   ;;  %v1535_v18 = vpack.c.bf16 %v1064_v26, %v1063_v8  ;;  %v1540_v56 = vpack.c.bf16 %v1066_v21, %v1065_v51  ;;  %v1545_v53 = vpack.c.bf16 %v1068_v19, %v1067_v38 }
 0x27d   :  { %v1550_v61 = vpack.c.bf16 %v1070_v3, %v1069_v33  ;;  %1600 = vst [vmem:[#allocation7 + $0x20] sm:$0xff] %v1460_v15   ;;  %v1555_v1 = vpack.c.bf16 %v1072_v49, %v1071_v40  ;;  %v1560_v50 = vpack.c.bf16 %v1074_v5, %v1073_v46  ;;  %v1565_v32 = vpack.c.bf16 %v1076_v13, %v1075_v10 }
 0x27e   :  { %v1570_v12 = vpack.c.bf16 %v1078_v24, %v1077_v27  ;;  %1601 = vst [vmem:[#allocation7 + $0x28] sm:$0xff] %v1465_v31   ;;  %v1575_v58 = vpack.c.bf16 %v1080_v44, %v1079_v59  ;;  %v1580_v55 = vpack.c.bf16 %v1082_v23, %v1081_v28  ;;  %v1585_v37 = vpack.c.bf16 %v1084_v62, %v1083_v41 }
 0x27f   :  { %v1590_v0 = vpack.c.bf16 %v1086_v57, %v1085_v39  ;;  %1602 = vst [vmem:[#allocation7 + $0x30] sm:$0xff] %v1470_v2  }
 0x280   :  { %1603 = vst [vmem:[#allocation7 + $0x38] sm:$0xff] %v1475_v11  }
 0x281   :  { %1604 = vst [vmem:[#allocation7 + $0x40] sm:$0xff] %v1480_v35  }
 0x282   :  { %1605 = vst [vmem:[#allocation7 + $0x48] sm:$0xff] %v1485_v52  }
 0x283   :  { %1606 = vst [vmem:[#allocation7 + $0x50] sm:$0xff] %v1490_v29  }
 0x284   :  { %1607 = vst [vmem:[#allocation7 + $0x58] sm:$0xff] %v1495_v34  }
 0x285   :  { %1608 = vst [vmem:[#allocation7 + $0x60] sm:$0xff] %v1500_v16  }
 0x286   :  { %1609 = vst [vmem:[#allocation7 + $0x68] sm:$0xff] %v1505_v54  }
 0x287   :  { %1610 = vst [vmem:[#allocation7 + $0x70] sm:$0xff] %v1510_v25  }
 0x288   :  { %1611 = vst [vmem:[#allocation7 + $0x78] sm:$0xff] %v1515_v60  }
 0x289   :  { %1612 = vst [vmem:[#allocation7 + $0x80] sm:$0xff] %v1520_v7  }
 0x28a   :  { %1613 = vst [vmem:[#allocation7 + $0x88] sm:$0xff] %v1525_v4  }
 0x28b   :  { %1614 = vst [vmem:[#allocation7 + $0x90] sm:$0xff] %v1530_v17  }
 0x28c   :  { %1615 = vst [vmem:[#allocation7 + $0x98] sm:$0xff] %v1535_v18  }
 0x28d   :  { %1616 = vst [vmem:[#allocation7 + $0xa0] sm:$0xff] %v1540_v56  }
 0x28e   :  { %1617 = vst [vmem:[#allocation7 + $0xa8] sm:$0xff] %v1545_v53  }
 0x28f   :  { %1618 = vst [vmem:[#allocation7 + $0xb0] sm:$0xff] %v1550_v61  }
 0x290   :  { %1619 = vst [vmem:[#allocation7 + $0xb8] sm:$0xff] %v1555_v1  }
 0x291   :  { %1620 = vst [vmem:[#allocation7 + $0xc0] sm:$0xff] %v1560_v50  }
 0x292   :  { %1621 = vst [vmem:[#allocation7 + $0xc8] sm:$0xff] %v1565_v32  }
 0x293   :  { %1622 = vst [vmem:[#allocation7 + $0xd0] sm:$0xff] %v1570_v12  }
 0x294   :  { %1623 = vst [vmem:[#allocation7 + $0xd8] sm:$0xff] %v1575_v58  }
 0x295   :  { %1624 = vst [vmem:[#allocation7 + $0xe0] sm:$0xff] %v1580_v55  }
 0x296   :  { %1625 = vst [vmem:[#allocation7 + $0xe8] sm:$0xff] %v1585_v37  }
 0x297   :  { %1626 = vst [vmem:[#allocation7 + $0xf0] sm:$0xff] %v1590_v0  }
 0x298   :  { %1229 = dma.vmem_to_hbm [thread:$0]  %s1222_s3, 4096, %s1224_s5, [#allocation4], %s1743_s23, %s1743_s23, %s1744_s24  }
 0x299   :  { %1740 = dma.done.wait [#allocation4], 4096  }
 0x29a   :  { %1741 = vsyncadd [#allocation4], 4294963200 }
 0x29b   :  { %1234 = vsyncpa [#allocation3], 1 }
 0x29c   :  { %1235 = vsyncpa [#allocation6], 1 }
 0x29d   :  { %1236 = vsyncpa [#allocation4], 1 }

</bundles_post_ra>
